<compile_context>
chip_gen: v7x
topology: tpu7x:2x2x1
jax: 0.10.0
libtpu: 0.0.40
codegen_flags: <defaults>
</compile_context>

<pallas_src>
import jax
import jax.numpy as jnp
from jax.experimental import pallas as pl
from jax.experimental.pallas import tpu as pltpu

IN_DIM = 3 * 28 * 28      # 2352
H1 = 500
H2 = 256
OUT_DIM = 10

# 128-lane aligned (padded) output dims used inside the kernel.
H1_PAD = 512              # ceil(500/128)*128
H2_PAD = 256              # already aligned
OUT_PAD = 128             # lane-dense output store; sliced to 10 in the wrapper

MAX_BATCH_TILE = 512      # keeps the double-buffered f32 x tile + weights
                          # within a 32 MiB scoped-VMEM budget on every gen


def _round_up(x, m):
    return (x + m - 1) // m * m


def _mlp_kernel(x_ref, w1_ref, b1_ref, w2_ref, b2_ref, w3_ref, b3_ref, o_ref):
    # x arrives as f32 straight from HBM (no wrapper prepass); cast in VMEM.
    x = x_ref[...].astype(jnp.bfloat16)
    # fc1 + ReLU (bf16 operands, f32 MXU accumulation, f32 bias/ReLU)
    h1 = jnp.dot(x, w1_ref[...], preferred_element_type=jnp.float32)
    h1 = jnp.maximum(h1 + b1_ref[...], 0.0)
    # fc2 + ReLU
    h2 = jnp.dot(h1.astype(jnp.bfloat16), w2_ref[...],
                 preferred_element_type=jnp.float32)
    h2 = jnp.maximum(h2 + b2_ref[...], 0.0)
    # fc3 (no activation); bf16 lane-dense store, wrapper casts back to f32
    out = jnp.dot(h2.astype(jnp.bfloat16), w3_ref[...],
                  preferred_element_type=jnp.float32)
    o_ref[...] = (out + b3_ref[...]).astype(o_ref.dtype)


def init_params(key):
    """Deterministic init mimicking torch.nn.Linear default:
    weight, bias ~ U(-1/sqrt(fan_in), 1/sqrt(fan_in)).
    Weights stored transposed to (in, out); biases as (1, out).  f32, unpadded."""
    def linear(k, fan_in, fan_out):
        kw, kb = jax.random.split(k)
        bound = 1.0 / jnp.sqrt(float(fan_in))
        w = jax.random.uniform(kw, (fan_in, fan_out), jnp.float32, -bound, bound)
        b = jax.random.uniform(kb, (1, fan_out), jnp.float32, -bound, bound)
        return w, b

    k1, k2, k3 = jax.random.split(key, 3)
    w1, b1 = linear(k1, IN_DIM, H1)
    w2, b2 = linear(k2, H1, H2)
    w3, b3 = linear(k3, H2, OUT_DIM)
    return (w1, b1, w2, b2, w3, b3)


def prepare_params(params_f32):
    """Zero-pad output dims to 128-aligned shapes and cast weights to bf16.
    w1 keeps its natural 2352 rows (full-extent block; no x padding needed).
    Zero padding keeps the valid region numerically unchanged."""
    w1, b1, w2, b2, w3, b3 = params_f32
    w1p = jnp.zeros((IN_DIM, H1_PAD), jnp.float32).at[:, :H1].set(w1)
    b1p = jnp.zeros((1, H1_PAD), jnp.float32).at[:, :H1].set(b1)
    w2p = jnp.zeros((H1_PAD, H2_PAD), jnp.float32).at[:H1, :H2].set(w2)
    b2p = jnp.zeros((1, H2_PAD), jnp.float32).at[:, :H2].set(b2)
    w3p = jnp.zeros((H2_PAD, OUT_PAD), jnp.float32).at[:H2, :OUT_DIM].set(w3)
    b3p = jnp.zeros((1, OUT_PAD), jnp.float32).at[:, :OUT_DIM].set(b3)
    return (w1p.astype(jnp.bfloat16), b1p,
            w2p.astype(jnp.bfloat16), b2p,
            w3p.astype(jnp.bfloat16), b3p)


def _choose_batch_tile(B):
    """Smallest 8-aligned tile for tiny batches; otherwise split into >= 2 grid
    steps (v7x dual-TC sharding + DMA/compute overlap), capped at MAX_BATCH_TILE."""
    if B <= 8:
        return _round_up(B, 8)
    return min(MAX_BATCH_TILE, _round_up((B + 1) // 2, 8))


def net_forward(x, padded_params):
    """x: (B, 3, 28, 28) float32 (NCHW). Returns (B, 10) float32 logits."""
    w1, b1, w2, b2, w3, b3 = padded_params
    B = x.shape[0]

    # Flatten row-major like torch x.view(-1, 3*28*28).  No feature-dim pad or
    # dtype prepass: the kernel reads f32 (bp, 2352) directly.
    x2d = x.reshape(B, IN_DIM).astype(jnp.float32)

    tb = _choose_batch_tile(B)
    bp = _round_up(B, tb)
    if bp != B:
        x2d = jnp.pad(x2d, ((0, bp - B), (0, 0)))

    resident = lambda shape: pl.BlockSpec(shape, lambda i: (0, 0))

    flops = 2 * bp * (IN_DIM * H1 + H1 * H2 + H2 * OUT_DIM)
    bytes_accessed = (
        bp * IN_DIM * 4                                                # x (f32)
        + (IN_DIM * H1_PAD + H1_PAD * H2_PAD + H2_PAD * OUT_PAD) * 2   # bf16 weights
        + (H1_PAD + H2_PAD + OUT_PAD) * 4                              # f32 biases
        + bp * OUT_PAD * 2                                             # bf16 logits
    )

    out = pl.pallas_call(
        _mlp_kernel,
        out_shape=jax.ShapeDtypeStruct((bp, OUT_PAD), jnp.bfloat16),
        grid=(bp // tb,),
        in_specs=[
            # x: batch-tiled; last dim is the full array extent (2352), so the
            # (8,128) divisibility rule is satisfied without padding.
            pl.BlockSpec((tb, IN_DIM), lambda i: (i, 0)),
            resident((IN_DIM, H1_PAD)), resident((1, H1_PAD)),    # fc1 (VMEM-resident)
            resident((H1_PAD, H2_PAD)), resident((1, H2_PAD)),    # fc2
            resident((H2_PAD, OUT_PAD)), resident((1, OUT_PAD)),  # fc3
        ],
        out_specs=pl.BlockSpec((tb, OUT_PAD), lambda i: (i, 0)),
        compiler_params=pltpu.CompilerParams(
            dimension_semantics=("parallel",),
            vmem_limit_bytes=32 * 1024 * 1024,
        ),
        cost_estimate=pl.CostEstimate(
            flops=flops, transcendentals=0, bytes_accessed=bytes_accessed),
    )(x2d, w1, b1, w2, b2, w3, b3)

    return out[:B, :OUT_DIM].astype(jnp.float32)


def _reference(x, params_f32):
    """Pure-JAX reference with the same precision choices as the kernel
    (bf16 matmul operands, f32 accumulation, f32 bias/ReLU)."""
    w1, b1, w2, b2, w3, b3 = params_f32
    h = x.reshape(x.shape[0], IN_DIM).astype(jnp.bfloat16)
    h = jnp.dot(h, w1.astype(jnp.bfloat16), preferred_element_type=jnp.float32) + b1
    h = jnp.maximum(h, 0.0).astype(jnp.bfloat16)
    h = jnp.dot(h, w2.astype(jnp.bfloat16), preferred_element_type=jnp.float32) + b2
    h = jnp.maximum(h, 0.0).astype(jnp.bfloat16)
    return jnp.dot(h, w3.astype(jnp.bfloat16), preferred_element_type=jnp.float32) + b3


if __name__ == "__main__":
    key = jax.random.PRNGKey(0)
    kx, kp = jax.random.split(key)

    B = 4
    x = jax.random.normal(kx, (B, 3, 28, 28), dtype=jnp.float32)
    params = init_params(kp)
    padded_params = prepare_params(params)

    out = net_forward(x, padded_params)
    out = jax.block_until_ready(out)

    ref = _reference(x, params)
    assert out.shape == (B, OUT_DIM), out.shape
    assert jnp.allclose(out, ref, atol=2e-2, rtol=2e-2), "mismatch vs reference"

    print("KERNEL_OK")
</pallas_src>

<mosaic_0001>
module attributes {stable_mosaic.version = 11 : i64} {
  func.func @_mlp_kernel(%arg0: i32, %arg1: memref<8x2352xf32, #tpu.memory_space<vmem>>, %arg2: memref<2352x512xbf16, #tpu.memory_space<vmem>>, %arg3: memref<1x512xf32, #tpu.memory_space<vmem>>, %arg4: memref<512x256xbf16, #tpu.memory_space<vmem>>, %arg5: memref<1x256xf32, #tpu.memory_space<vmem>>, %arg6: memref<256x128xbf16, #tpu.memory_space<vmem>>, %arg7: memref<1x128xf32, #tpu.memory_space<vmem>>, %arg8: memref<8x128xbf16, #tpu.memory_space<vmem>>) attributes {dimension_semantics = [#tpu.dimension_semantics<parallel>], iteration_bounds = array<i64: 1>, scalar_prefetch = 0 : i64, scratch_operands = 0 : i64, tpu.core_type = #tpu.core_type<tc>, window_params = [{transform_indices = @transform_0, window_bounds = array<i64: 8, 2352>}, {pipeline_mode = #tpu.pipeline_mode<synchronous>, transform_indices = @transform_1, window_bounds = array<i64: 2352, 512>}, {pipeline_mode = #tpu.pipeline_mode<synchronous>, transform_indices = @transform_2, window_bounds = array<i64: 1, 512>}, {pipeline_mode = #tpu.pipeline_mode<synchronous>, transform_indices = @transform_3, window_bounds = array<i64: 512, 256>}, {pipeline_mode = #tpu.pipeline_mode<synchronous>, transform_indices = @transform_4, window_bounds = array<i64: 1, 256>}, {pipeline_mode = #tpu.pipeline_mode<synchronous>, transform_indices = @transform_5, window_bounds = array<i64: 256, 128>}, {pipeline_mode = #tpu.pipeline_mode<synchronous>, transform_indices = @transform_6, window_bounds = array<i64: 1, 128>}, {transform_indices = @transform_7, window_bounds = array<i64: 8, 128>}]} {
    %c0 = arith.constant 0 : index
    %c0_0 = arith.constant 0 : index
    %0 = vector.load %arg1[%c0, %c0_0] : memref<8x2352xf32, #tpu.memory_space<vmem>>, vector<8x2352xf32>
    %1 = arith.truncf %0 : vector<8x2352xf32> to vector<8x2352xbf16>
    %c0_1 = arith.constant 0 : index
    %c0_2 = arith.constant 0 : index
    %2 = vector.load %arg2[%c0_1, %c0_2] : memref<2352x512xbf16, #tpu.memory_space<vmem>>, vector<2352x512xbf16>
    %cst = arith.constant dense<0.000000e+00> : vector<8x512xf32>
    %3 = tpu.matmul %1, %2, %cst {dimension_numbers = #tpu.dot_dimension_numbers<[1], [0], [0], [1], [0, 0, 1, 1], [], []>} : vector<8x2352xbf16>, vector<2352x512xbf16>, vector<8x512xf32> -> vector<8x512xf32>
    %c0_3 = arith.constant 0 : index
    %c0_4 = arith.constant 0 : index
    %4 = vector.load %arg3[%c0_3, %c0_4] : memref<1x512xf32, #tpu.memory_space<vmem>>, vector<1x512xf32>
    %5 = vector.broadcast %4 : vector<1x512xf32> to vector<8x512xf32>
    %6 = arith.addf %3, %5 : vector<8x512xf32>
    %cst_5 = arith.constant 0.000000e+00 : f32
    %7 = vector.broadcast %cst_5 : f32 to vector<8x512xf32>
    %8 = arith.maximumf %6, %7 : vector<8x512xf32>
    %9 = arith.truncf %8 : vector<8x512xf32> to vector<8x512xbf16>
    %c0_6 = arith.constant 0 : index
    %c0_7 = arith.constant 0 : index
    %10 = vector.load %arg4[%c0_6, %c0_7] : memref<512x256xbf16, #tpu.memory_space<vmem>>, vector<512x256xbf16>
    %cst_8 = arith.constant dense<0.000000e+00> : vector<8x256xf32>
    %11 = tpu.matmul %9, %10, %cst_8 {dimension_numbers = #tpu.dot_dimension_numbers<[1], [0], [0], [1], [0, 0, 1, 1], [], []>} : vector<8x512xbf16>, vector<512x256xbf16>, vector<8x256xf32> -> vector<8x256xf32>
    %c0_9 = arith.constant 0 : index
    %c0_10 = arith.constant 0 : index
    %12 = vector.load %arg5[%c0_9, %c0_10] : memref<1x256xf32, #tpu.memory_space<vmem>>, vector<1x256xf32>
    %13 = vector.broadcast %12 : vector<1x256xf32> to vector<8x256xf32>
    %14 = arith.addf %11, %13 : vector<8x256xf32>
    %cst_11 = arith.constant 0.000000e+00 : f32
    %15 = vector.broadcast %cst_11 : f32 to vector<8x256xf32>
    %16 = arith.maximumf %14, %15 : vector<8x256xf32>
    %17 = arith.truncf %16 : vector<8x256xf32> to vector<8x256xbf16>
    %c0_12 = arith.constant 0 : index
    %c0_13 = arith.constant 0 : index
    %18 = vector.load %arg6[%c0_12, %c0_13] : memref<256x128xbf16, #tpu.memory_space<vmem>>, vector<256x128xbf16>
    %cst_14 = arith.constant dense<0.000000e+00> : vector<8x128xf32>
    %19 = tpu.matmul %17, %18, %cst_14 {dimension_numbers = #tpu.dot_dimension_numbers<[1], [0], [0], [1], [0, 0, 1, 1], [], []>} : vector<8x256xbf16>, vector<256x128xbf16>, vector<8x128xf32> -> vector<8x128xf32>
    %c0_15 = arith.constant 0 : index
    %c0_16 = arith.constant 0 : index
    %20 = vector.load %arg7[%c0_15, %c0_16] : memref<1x128xf32, #tpu.memory_space<vmem>>, vector<1x128xf32>
    %21 = vector.broadcast %20 : vector<1x128xf32> to vector<8x128xf32>
    %22 = arith.addf %19, %21 : vector<8x128xf32>
    %23 = arith.truncf %22 : vector<8x128xf32> to vector<8x128xbf16>
    %c0_17 = arith.constant 0 : index
    %c0_18 = arith.constant 0 : index
    %24 = vector.load %arg8[%c0_17, %c0_18] : memref<8x128xbf16, #tpu.memory_space<vmem>>, vector<8x128xbf16>
    tpu.vector_store %arg8[%c0_17, %c0_18], %23 {strides = array<i32>} : memref<8x128xbf16, #tpu.memory_space<vmem>>, vector<8x128xbf16>,
    return
  }
  func.func @transform_0(%arg0: i32) -> (i32, i32) {
    %c0_i32 = arith.constant 0 : i32
    %c0_i32_0 = arith.constant 0 : i32
    return %arg0, %c0_i32 : i32, i32
  }
  func.func @transform_1(%arg0: i32) -> (i32, i32) {
    %c0_i32 = arith.constant 0 : i32
    %c0_i32_0 = arith.constant 0 : i32
    %c0_i32_1 = arith.constant 0 : i32
    return %c0_i32, %c0_i32_0 : i32, i32
  }
  func.func @transform_2(%arg0: i32) -> (i32, i32) {
    %c0_i32 = arith.constant 0 : i32
    %c0_i32_0 = arith.constant 0 : i32
    %c0_i32_1 = arith.constant 0 : i32
    return %c0_i32, %c0_i32_0 : i32, i32
  }
  func.func @transform_3(%arg0: i32) -> (i32, i32) {
    %c0_i32 = arith.constant 0 : i32
    %c0_i32_0 = arith.constant 0 : i32
    %c0_i32_1 = arith.constant 0 : i32
    return %c0_i32, %c0_i32_0 : i32, i32
  }
  func.func @transform_4(%arg0: i32) -> (i32, i32) {
    %c0_i32 = arith.constant 0 : i32
    %c0_i32_0 = arith.constant 0 : i32
    %c0_i32_1 = arith.constant 0 : i32
    return %c0_i32, %c0_i32_0 : i32, i32
  }
  func.func @transform_5(%arg0: i32) -> (i32, i32) {
    %c0_i32 = arith.constant 0 : i32
    %c0_i32_0 = arith.constant 0 : i32
    %c0_i32_1 = arith.constant 0 : i32
    return %c0_i32, %c0_i32_0 : i32, i32
  }
  func.func @transform_6(%arg0: i32) -> (i32, i32) {
    %c0_i32 = arith.constant 0 : i32
    %c0_i32_0 = arith.constant 0 : i32
    %c0_i32_1 = arith.constant 0 : i32
    return %c0_i32, %c0_i32_0 : i32, i32
  }
  func.func @transform_7(%arg0: i32) -> (i32, i32) {
    %c0_i32 = arith.constant 0 : i32
    %c0_i32_0 = arith.constant 0 : i32
    return %arg0, %c0_i32 : i32, i32
  }
}

</mosaic_0001>

<bundles_post_ra>
// kernel: tpu_custom_call.1
= control target key start
LH: loop header
LB: loop body
LE: loop exit
PB: predicated region body
PF: predicated region fallthrough
CT: control target
= control target key end

     0   :  { %12 = vsyncpa [#allocation3], 0  ;;  %s7435_s0 = inlined_call_operand.hbm [shape: f32[8,2352], index: 0, kind: input, shape index: {}]   ;;  %s7436_s1 = inlined_call_operand.hbm [shape: bf16[2352,512], index: 1, kind: input, shape index: {}]   ;;  %s7437_s2 = inlined_call_operand.hbm [shape: f32[1,512], index: 2, kind: input, shape index: {}]   ;;  %s7438_s3 = inlined_call_operand.hbm [shape: bf16[512,256], index: 3, kind: input, shape index: {}]   ;;  %s7439_s4 = inlined_call_operand.hbm [shape: f32[1,256], index: 4, kind: input, shape index: {}]   ;;  %s7440_s5 = inlined_call_operand.hbm [shape: bf16[256,128], index: 5, kind: input, shape index: {}]   ;;  %s7441_s6 = inlined_call_operand.hbm [shape: f32[1,128], index: 6, kind: input, shape index: {}]   ;;  %s7442_s7 = inlined_call_operand.hbm [shape: bf16[8,128], index: 7, kind: output, shape index: {}]  }
   0x1   :  { %13 = vsyncpa [#allocation6], 0 }
   0x2   :  { %14 = vsyncpa [#allocation9], 0 }
   0x3   :  { %15 = vsyncpa [#allocation12], 0 }
   0x4   :  { %16 = vsyncpa [#allocation4], 0  ;;  %s7178_s24 = smov [#allocation5]   ;;  %s6992_s28 = scalar_lea.hbm %s7436_s1, 75264 }
   0x5   :  { %s32_s25 = sshll.u32 %s7178_s24, 4  ;;  %p6993_p0 = scmp.ne.s32.totalorder %s7436_s1, %s6992_s28  ;;  %s33_s25 = int_to_ptr.vmem [resolvable:$true] %s32_s25 }
   0x6   :  { %p6996_p1 = scmp.lt.u32.totalorder %s6992_s28, %s7436_s1 }
   0x8   :  { %p6998_p2 = pnand %p6996_p1, %p6993_p0 }
   0xa   :  { %7001 = shalt.err (!%p6998_p2)
}
   0xb   :  { %s7002_s10 = scalar_lea.vmem %s33_s25, 75264  ;;  %p7007_p4 = scmp.lt.s32.totalorder %s33_s25, %s33_s25 }
   0xc   :  { %p7003_p3 = scmp.ne.s32.totalorder %s33_s25, %s7002_s10  ;;  %p7008_p5 = scmp.lt.s32.totalorder %s7002_s10, %s7002_s10 }
   0xe   :  { %p7009_p6 = por %p7008_p5, %p7007_p4 }
  0x10   :  { %p7010_p7 = pnand %p7009_p6, %p7003_p3 }
  0x12   :  { %7013 = shalt.err (!%p7010_p7)
}
  0x13   :  { %s7179_s11 = smov 256   ;;  %s7180_s12 = smov 16  }
  0x14   :  { %38 = dma.hbm_to_vmem [thread:$0]  %s7436_s1, 75264, %s33_s25, [#allocation6], %s7179_s11, %s7179_s11, %s7180_s12  }
  0x15   :  { %s7181_s15 = smov [#allocation8]   ;;  %s7014_s19 = scalar_lea.hbm %s7438_s3, 8192 }
  0x16   :  { %s54_s16 = sshll.u32 %s7181_s15, 4  ;;  %p7015_p8 = scmp.ne.s32.totalorder %s7438_s3, %s7014_s19  ;;  %s55_s16 = int_to_ptr.vmem [resolvable:$true] %s54_s16 }
  0x17   :  { %p7018_p9 = scmp.lt.u32.totalorder %s7014_s19, %s7438_s3 }
  0x19   :  { %p7020_p10 = pnand %p7018_p9, %p7015_p8 }
  0x1b   :  { %7023 = shalt.err (!%p7020_p10)
}
  0x1c   :  { %s7024_s24 = scalar_lea.vmem %s55_s16, 8192  ;;  %p7029_p12 = scmp.lt.s32.totalorder %s55_s16, %s55_s16 }
  0x1d   :  { %p7025_p11 = scmp.ne.s32.totalorder %s55_s16, %s7024_s24  ;;  %p7030_p13 = scmp.lt.s32.totalorder %s7024_s24, %s7024_s24 }
  0x1f   :  { %p7031_p0 = por %p7030_p13, %p7029_p12 }
  0x21   :  { %p7032_p1 = pnand %p7031_p0, %p7025_p11 }
  0x23   :  { %7035 = shalt.err (!%p7032_p1)
}
  0x24   :  { %s7182_s1 = smov 128   ;;  %s7183_s25 = smov 8  }
  0x25   :  { %60 = dma.hbm_to_vmem [thread:$0]  %s7438_s3, 8192, %s55_s16, [#allocation9], %s7182_s1, %s7182_s1, %s7183_s25  }
  0x26   :  { %s7184_s28 = smov [#allocation11]   ;;  %s7036_s9 = scalar_lea.hbm %s7440_s5, 2048 }
  0x27   :  { %s76_s29 = sshll.u32 %s7184_s28, 4  ;;  %p7037_p2 = scmp.ne.s32.totalorder %s7440_s5, %s7036_s9  ;;  %s77_s29 = int_to_ptr.vmem [resolvable:$true] %s76_s29 }
  0x28   :  { %p7040_p3 = scmp.lt.u32.totalorder %s7036_s9, %s7440_s5 }
  0x2a   :  { %p7042_p4 = pnand %p7040_p3, %p7037_p2 }
  0x2c   :  { %7045 = shalt.err (!%p7042_p4)
}
  0x2d   :  { %s7046_s14 = scalar_lea.vmem %s77_s29, 2048  ;;  %p7051_p6 = scmp.lt.s32.totalorder %s77_s29, %s77_s29 }
  0x2e   :  { %p7047_p5 = scmp.ne.s32.totalorder %s77_s29, %s7046_s14  ;;  %p7052_p7 = scmp.lt.s32.totalorder %s7046_s14, %s7046_s14 }
  0x30   :  { %p7053_p8 = por %p7052_p7, %p7051_p6 }
  0x32   :  { %p7054_p9 = pnand %p7053_p8, %p7047_p5 }
  0x34   :  { %7057 = shalt.err (!%p7054_p9)
}
  0x35   :  { %s7185_s3 = smov 64   ;;  %s7186_s15 = smov 4  }
  0x36   :  { %82 = dma.hbm_to_vmem [thread:$0]  %s7440_s5, 2048, %s77_s29, [#allocation12], %s7185_s3, %s7185_s3, %s7186_s15  }
  0x37   :  { %s7187_s18 = smov [#allocation2]   ;;  %s7188_s20 = smov [#allocation7]  }
  0x38   :  { %s23_s19 = sshll.u32 %s7187_s18, 4  ;;  %s45_s21 = sshll.u32 %s7188_s20, 4  ;;  %s24_s19 = int_to_ptr.vmem [resolvable:$true] %s23_s19  ;;  %s46_s21 = int_to_ptr.vmem [resolvable:$true] %s45_s21 }
  0x39   :  { %s7058_s24 = scalar_lea.hbm %s7435_s0, 2432 }
  0x3a   :  { %p7059_p10 = scmp.ne.s32.totalorder %s7435_s0, %s7058_s24  ;;  %p7062_p11 = scmp.lt.u32.totalorder %s7058_s24, %s7435_s0 }
  0x3c   :  { %p7064_p12 = pnand %p7062_p11, %p7059_p10 }
  0x3e   :  { %7067 = shalt.err (!%p7064_p12)
}
  0x3f   :  { %s7068_s5 = scalar_lea.vmem %s24_s19, 2432  ;;  %p7073_p0 = scmp.lt.s32.totalorder %s24_s19, %s24_s19 }
  0x40   :  { %p7069_p13 = scmp.ne.s32.totalorder %s24_s19, %s7068_s5  ;;  %p7074_p1 = scmp.lt.s32.totalorder %s7068_s5, %s7068_s5 }
  0x42   :  { %p7075_p2 = por %p7074_p1, %p7073_p0 }
  0x44   :  { %p7076_p3 = pnand %p7075_p2, %p7069_p13 }
  0x46   :  { %7079 = shalt.err (!%p7076_p3)
}
  0x47   :  { %26 = dma.hbm_to_vmem [thread:$0]  %s7435_s0, 2432, %s24_s19, [#allocation3]  }
  0x48   :  { %s7080_s9 = scalar_lea.hbm %s7437_s2, 64 }
  0x49   :  { %p7081_p4 = scmp.ne.s32.totalorder %s7437_s2, %s7080_s9  ;;  %p7084_p5 = scmp.lt.u32.totalorder %s7080_s9, %s7437_s2 }
  0x4b   :  { %p7086_p6 = pnand %p7084_p5, %p7081_p4 }
  0x4d   :  { %7089 = shalt.err (!%p7086_p6)
}
  0x4e   :  { %s7090_s14 = scalar_lea.vmem %s46_s21, 64  ;;  %p7095_p8 = scmp.lt.s32.totalorder %s46_s21, %s46_s21 }
  0x4f   :  { %p7091_p7 = scmp.ne.s32.totalorder %s46_s21, %s7090_s14  ;;  %p7096_p9 = scmp.lt.s32.totalorder %s7090_s14, %s7090_s14 }
  0x51   :  { %p7097_p10 = por %p7096_p9, %p7095_p8 }
  0x53   :  { %p7098_p11 = pnand %p7097_p10, %p7091_p7 }
  0x55   :  { %7101 = shalt.err (!%p7098_p11)
}
  0x56   :  { %48 = dma.hbm_to_vmem [thread:$0]  %s7437_s2, 64, %s46_s21, [#allocation6]  }
  0x57   :  { %s7189_s15 = smov [#allocation10]   ;;  %s7190_s17 = smov [#allocation13]  }
  0x58   :  { %s67_s16 = sshll.u32 %s7189_s15, 4  ;;  %s89_s18 = sshll.u32 %s7190_s17, 4  ;;  %s68_s16 = int_to_ptr.vmem [resolvable:$true] %s67_s16  ;;  %s90_s18 = int_to_ptr.vmem [resolvable:$true] %s89_s18 }
  0x59   :  { %s7102_s22 = scalar_lea.hbm %s7439_s4, 32 }
  0x5a   :  { %p7103_p12 = scmp.ne.s32.totalorder %s7439_s4, %s7102_s22  ;;  %p7106_p13 = scmp.lt.u32.totalorder %s7102_s22, %s7439_s4 }
  0x5c   :  { %p7108_p0 = pnand %p7106_p13, %p7103_p12 }
  0x5e   :  { %7111 = shalt.err (!%p7108_p0)
}
  0x5f   :  { %s7112_s2 = scalar_lea.vmem %s68_s16, 32  ;;  %p7117_p2 = scmp.lt.s32.totalorder %s68_s16, %s68_s16 }
  0x60   :  { %p7113_p1 = scmp.ne.s32.totalorder %s68_s16, %s7112_s2  ;;  %p7118_p3 = scmp.lt.s32.totalorder %s7112_s2, %s7112_s2 }
  0x62   :  { %p7119_p4 = por %p7118_p3, %p7117_p2 }
  0x64   :  { %p7120_p5 = pnand %p7119_p4, %p7113_p1 }
  0x66   :  { %7123 = shalt.err (!%p7120_p5)
}
  0x67   :  { %70 = dma.hbm_to_vmem [thread:$0]  %s7439_s4, 32, %s68_s16, [#allocation9]  }
  0x68   :  { %s7124_s28 = scalar_lea.hbm %s7441_s6, 16 }
  0x69   :  { %p7125_p6 = scmp.ne.s32.totalorder %s7441_s6, %s7124_s28  ;;  %p7128_p7 = scmp.lt.u32.totalorder %s7124_s28, %s7441_s6 }
  0x6b   :  { %p7130_p8 = pnand %p7128_p7, %p7125_p6 }
  0x6d   :  { %7133 = shalt.err (!%p7130_p8)
}
  0x6e   :  { %s7134_s10 = scalar_lea.vmem %s90_s18, 16  ;;  %s7138_s11 = scalar_lea.vmem %s90_s18, 32 }
  0x6f   :  { %p7135_p9 = scmp.ne.s32.totalorder %s90_s18, %s7134_s10  ;;  %p7139_p10 = scmp.lt.s32.totalorder %s90_s18, %s90_s18 }
  0x70   :  { %p7140_p11 = scmp.lt.s32.totalorder %s7138_s11, %s7134_s10 }
  0x72   :  { %p7141_p12 = por %p7140_p11, %p7139_p10 }
  0x74   :  { %p7142_p13 = pnand %p7141_p12, %p7135_p9 }
  0x76   :  { %7145 = shalt.err (!%p7142_p13)
}
  0x77   :  { %92 = dma.hbm_to_vmem [thread:$0]  %s7441_s6, 16, %s90_s18, [#allocation12]  }
  0x78   :  { %7168 = dma.done.wait [#allocation3], 2432  }
  0x79   :  { %7169 = vsyncadd [#allocation3], 4294964864 }
  0x7a   :  { %7170 = dma.done.wait [#allocation6], 75328  }
  0x7b   :  { %7171 = vsyncadd [#allocation6], 4294891968 }
  0x7c   :  { %7172 = dma.done.wait [#allocation9], 8224  }
  0x7d   :  { %7173 = vsyncadd [#allocation9], 4294959072 }
  0x7e   :  { %7174 = dma.done.wait [#allocation12], 2064  }
  0x7f   :  { %7175 = vsyncadd [#allocation12], 4294965232  ;;  %v5998_v0 = vld [vmem:[#allocation5 + $0x4] ss:$16 sps:$4 sm:$0xff]   ;;  %v6002_v2 = vld [vmem:[#allocation5] ss:$16 sps:$4 sm:$0xff]  }
  0x80   :  { %v6000_v1 = vld [vmem:[#allocation5 + $0x204] ss:$16 sps:$4 sm:$0xff]   ;;  %3707 = vmatprep.subr.bf16.mxu1 %v5998_v0  ;;  %v6003_v3 = vld [vmem:[#allocation5 + $0x200] ss:$16 sps:$4 sm:$0xff]   ;;  %vm3703_vm0 = vcmask 392192   ;;  %s7192_s6 = smov [#allocation14]  }
  0x81   :  { %3748 = vmatprep.subr.bf16.mxu0 %v6000_v1  ;;  %v6004_v4 = vld [vmem:[#allocation5 + $0x24] ss:$16 sps:$4 sm:$0xff]   ;;  %3708 = vmatpush1.bf16.msra.mxu1 %v6002_v2  ;;  %v6008_v6 = vld [vmem:[#allocation5 + $0x20] ss:$16 sps:$4 sm:$0xff]   ;;  %s5200_s13 = sshll.u32 %s7192_s6, 4  ;;  %s5201_s13 = int_to_ptr.vmem [resolvable:$true] %s5200_s13 }
  0x82   :  { %3749 = vmatpush1.bf16.msra.mxu0 %v6003_v3  ;;  %v6006_v5 = vld [vmem:[#allocation5 + $0x224] ss:$16 sps:$4 sm:$0xff]   ;;  %3709 = vmatprep.subr.bf16.mxu1 %v6004_v4  ;;  %v6009_v7 = vld [vmem:[#allocation5 + $0x220] ss:$16 sps:$4 sm:$0xff]   ;;  %v115_v4 = vld [vmem:[#allocation2] sm:$0xff]  ;;  %s7146_s14 = scalar_lea.vmem %s5201_s13, 64  ;;  %p7151_p1 = scmp.lt.s32.totalorder %s5201_s13, %s5201_s13 }
  0x83   :  { %3750 = vmatprep.subr.bf16.mxu0 %v6006_v5  ;;  %v6010_v8 = vld [vmem:[#allocation5 + $0x44] ss:$16 sps:$4 sm:$0xff]   ;;  %v6014_v10 = vld [vmem:[#allocation5 + $0x40] ss:$16 sps:$4 sm:$0xff]   ;;  %p7147_p0 = scmp.ne.s32.totalorder %s5201_s13, %s7146_s14  ;;  %p7152_p2 = scmp.lt.s32.totalorder %s7146_s14, %s7146_s14 }
  0x84   :  { %v6012_v9 = vld [vmem:[#allocation5 + $0x244] ss:$16 sps:$4 sm:$0xff]   ;;  %v6015_v11 = vld [vmem:[#allocation5 + $0x240] ss:$16 sps:$4 sm:$0xff]  }
  0x85   :  { %3710 = vmatpush1.bf16.msra.mxu1 %v6008_v6  ;;  %v6016_v12 = vld [vmem:[#allocation5 + $0x64] ss:$16 sps:$4 sm:$0xff]   ;;  %v6020_v14 = vld [vmem:[#allocation5 + $0x60] ss:$16 sps:$4 sm:$0xff]   ;;  %v117_v6 = vld [vmem:[#allocation2 + $0x10] sm:$0xff]  ;;  %p7153_p3 = por %p7152_p2, %p7151_p1 }
  0x86   :  { %3751 = vmatpush1.bf16.msra.mxu0 %v6009_v7  ;;  %3711 = vmatprep.subr.bf16.mxu1 %v6010_v8  ;;  %v6018_v13 = vld [vmem:[#allocation5 + $0x264] ss:$16 sps:$4 sm:$0xff]   ;;  %v6021_v15 = vld [vmem:[#allocation5 + $0x260] ss:$16 sps:$4 sm:$0xff]   ;;  %v6099_v7 = vld [vmem:[#allocation5 + $0xc] ss:$16 sps:$4 sm:$0xff]   ;;  %v7323_v8 = vpack.c.bf16 %v115_v4, %v115_v4 }
  0x87   :  { %3752 = vmatprep.subr.bf16.mxu0 %v6012_v9  ;;  %v6022_v16 = vld [vmem:[#allocation5 + $0x84] ss:$16 sps:$4 sm:$0xff]   ;;  %v6026_v18 = vld [vmem:[#allocation5 + $0x80] ss:$16 sps:$4 sm:$0xff]   ;;  %v6183_v4 = vld [vmem:[#allocation5 + $0x1cc] ss:$16 sps:$4 sm:$0xff]   ;;  %p7154_p4 = pnand %p7153_p3, %p7147_p0 }
  0x88   :  { %v6024_v17 = vld [vmem:[#allocation5 + $0x284] ss:$16 sps:$4 sm:$0xff]   ;;  %v6027_v19 = vld [vmem:[#allocation5 + $0x280] ss:$16 sps:$4 sm:$0xff]  }
  0x89   :  { %3712 = vmatpush1.bf16.msra.mxu1 %v6014_v10  ;;  %v6028_v20 = vld [vmem:[#allocation5 + $0xa4] ss:$16 sps:$4 sm:$0xff]   ;;  %v6032_v22 = vld [vmem:[#allocation5 + $0xa0] ss:$16 sps:$4 sm:$0xff]   ;;  %v6097_v10 = vld [vmem:[#allocation5 + $0x8] ss:$16 sps:$4 sm:$0xff]  }
  0x8a   :  { %3753 = vmatpush1.bf16.msra.mxu0 %v6015_v11  ;;  %3713 = vmatprep.subr.bf16.mxu1 %v6016_v12  ;;  %v6030_v21 = vld [vmem:[#allocation5 + $0x2a4] ss:$16 sps:$4 sm:$0xff]   ;;  %v6033_v23 = vld [vmem:[#allocation5 + $0x2a0] ss:$16 sps:$4 sm:$0xff]   ;;  %v7325_v11 = vpack.c.bf16 %v117_v6, %v117_v6  ;;  %v6181_v6 = vld [vmem:[#allocation5 + $0x1c8] ss:$16 sps:$4 sm:$0xff]  }
  0x8b   :  { %3754 = vmatprep.subr.bf16.mxu0 %v6018_v13  ;;  %v6034_v24 = vld [vmem:[#allocation5 + $0xc4] ss:$16 sps:$4 sm:$0xff]   ;;  %v6038_v26 = vld [vmem:[#allocation5 + $0xc0] ss:$16 sps:$4 sm:$0xff]   ;;  %v6105_v13 = vld [vmem:[#allocation5 + $0x2c] ss:$16 sps:$4 sm:$0xff]  }
  0x8c   :  { %v6036_v25 = vld [vmem:[#allocation5 + $0x2c4] ss:$16 sps:$4 sm:$0xff]   ;;  %v6039_v27 = vld [vmem:[#allocation5 + $0x2c0] ss:$16 sps:$4 sm:$0xff]  }
  0x8d   :  { %3714 = vmatpush1.bf16.msra.mxu1 %v6020_v14  ;;  %v6040_v28 = vld [vmem:[#allocation5 + $0xe4] ss:$16 sps:$4 sm:$0xff]   ;;  %v6044_v30 = vld [vmem:[#allocation5 + $0xe0] ss:$16 sps:$4 sm:$0xff]  }
  0x8e   :  { %3755 = vmatpush1.bf16.msra.mxu0 %v6021_v15  ;;  %3715 = vmatprep.subr.bf16.mxu1 %v6022_v16  ;;  %v6042_v29 = vld [vmem:[#allocation5 + $0x2e4] ss:$16 sps:$4 sm:$0xff]   ;;  %v6045_v31 = vld [vmem:[#allocation5 + $0x2e0] ss:$16 sps:$4 sm:$0xff]   ;;  %v6103_v15 = vld [vmem:[#allocation5 + $0x28] ss:$16 sps:$4 sm:$0xff]  }
  0x8f   :  { %3756 = vmatprep.subr.bf16.mxu0 %v6024_v17  ;;  %v6046_v32 = vld [vmem:[#allocation5 + $0x104] ss:$16 sps:$4 sm:$0xff]   ;;  %v6050_v34 = vld [vmem:[#allocation5 + $0x100] ss:$16 sps:$4 sm:$0xff]   ;;  %v6111_v17 = vld [vmem:[#allocation5 + $0x4c] ss:$16 sps:$4 sm:$0xff]  }
  0x90   :  { %v6048_v33 = vld [vmem:[#allocation5 + $0x304] ss:$16 sps:$4 sm:$0xff]   ;;  %v6051_v35 = vld [vmem:[#allocation5 + $0x300] ss:$16 sps:$4 sm:$0xff]  }
  0x91   :  { %3716 = vmatpush1.bf16.msra.mxu1 %v6026_v18  ;;  %v6052_v36 = vld [vmem:[#allocation5 + $0x124] ss:$16 sps:$4 sm:$0xff]   ;;  %v6056_v38 = vld [vmem:[#allocation5 + $0x120] ss:$16 sps:$4 sm:$0xff]  }
  0x92   :  { %3757 = vmatpush1.bf16.msra.mxu0 %v6027_v19  ;;  %3717 = vmatprep.subr.bf16.mxu1 %v6028_v20  ;;  %v6054_v37 = vld [vmem:[#allocation5 + $0x324] ss:$16 sps:$4 sm:$0xff]   ;;  %v6057_v39 = vld [vmem:[#allocation5 + $0x320] ss:$16 sps:$4 sm:$0xff]   ;;  %v6109_v19 = vld [vmem:[#allocation5 + $0x48] ss:$16 sps:$4 sm:$0xff]  }
  0x93   :  { %3758 = vmatprep.subr.bf16.mxu0 %v6030_v21  ;;  %v6058_v40 = vld [vmem:[#allocation5 + $0x144] ss:$16 sps:$4 sm:$0xff]   ;;  %v6062_v42 = vld [vmem:[#allocation5 + $0x140] ss:$16 sps:$4 sm:$0xff]   ;;  %v6117_v21 = vld [vmem:[#allocation5 + $0x6c] ss:$16 sps:$4 sm:$0xff]  }
  0x94   :  { %v6060_v41 = vld [vmem:[#allocation5 + $0x344] ss:$16 sps:$4 sm:$0xff]   ;;  %v6063_v43 = vld [vmem:[#allocation5 + $0x340] ss:$16 sps:$4 sm:$0xff]  }
  0x95   :  { %3718 = vmatpush1.bf16.msra.mxu1 %v6032_v22  ;;  %v6064_v44 = vld [vmem:[#allocation5 + $0x164] ss:$16 sps:$4 sm:$0xff]   ;;  %v6068_v47 = vld [vmem:[#allocation5 + $0x160] ss:$16 sps:$4 sm:$0xff]  }
  0x96   :  { %3759 = vmatpush1.bf16.msra.mxu0 %v6033_v23  ;;  %3719 = vmatprep.subr.bf16.mxu1 %v6034_v24  ;;  %v6066_v45 = vld [vmem:[#allocation5 + $0x364] ss:$16 sps:$4 sm:$0xff]   ;;  %v6069_v50 = vld [vmem:[#allocation5 + $0x360] ss:$16 sps:$4 sm:$0xff]   ;;  %v6115_v23 = vld [vmem:[#allocation5 + $0x68] ss:$16 sps:$4 sm:$0xff]  }
  0x97   :  { %3760 = vmatprep.subr.bf16.mxu0 %v6036_v25  ;;  %v116_v46 = vld [vmem:[#allocation2 + $0x8] sm:$0xff]  ;;  %v118_v49 = vld [vmem:[#allocation2 + $0x18] sm:$0xff]  ;;  %v6123_v25 = vld [vmem:[#allocation5 + $0x8c] ss:$16 sps:$4 sm:$0xff]  }
  0x98   :  { %v7317_v48 = vpack.c.bf16 %v116_v46, %v116_v46  ;;  %v6070_v51 = vld [vmem:[#allocation5 + $0x184] ss:$16 sps:$4 sm:$0xff]   ;;  %v7319_v52 = vpack.c.bf16 %v118_v49, %v118_v49  ;;  %v6074_v54 = vld [vmem:[#allocation5 + $0x180] ss:$16 sps:$4 sm:$0xff]   ;;  %v6151_v49 = vld [vmem:[#allocation5 + $0x128] ss:$16 sps:$4 sm:$0xff]  }
  0x99   :  { %3720 = vmatpush1.bf16.msra.mxu1 %v6038_v26  ;;  %v6072_v53 = vld [vmem:[#allocation5 + $0x384] ss:$16 sps:$4 sm:$0xff]   ;;  %v6075_v55 = vld [vmem:[#allocation5 + $0x380] ss:$16 sps:$4 sm:$0xff]  }
  0x9a   :  { %3761 = vmatpush1.bf16.msra.mxu0 %v6039_v27  ;;  %3721 = vmatprep.subr.bf16.mxu1 %v6040_v28  ;;  %v6076_v56 = vld [vmem:[#allocation5 + $0x1a4] ss:$16 sps:$4 sm:$0xff]   ;;  %v6080_v58 = vld [vmem:[#allocation5 + $0x1a0] ss:$16 sps:$4 sm:$0xff]   ;;  %v6121_v27 = vld [vmem:[#allocation5 + $0x88] ss:$16 sps:$4 sm:$0xff]  }
  0x9b   :  { %3762 = vmatprep.subr.bf16.mxu0 %v6042_v29  ;;  %3739 = vmatprep.mubr.bf16.mxu1 %v7317_v48  ;;  %v6078_v57 = vld [vmem:[#allocation5 + $0x3a4] ss:$16 sps:$4 sm:$0xff]   ;;  %v6081_v59 = vld [vmem:[#allocation5 + $0x3a0] ss:$16 sps:$4 sm:$0xff]   ;;  %v6129_v29 = vld [vmem:[#allocation5 + $0xac] ss:$16 sps:$4 sm:$0xff]  }
  0x9c   :  { %3780 = vmatprep.mubr.bf16.mxu0 %v7319_v52  ;;  %v6082_v60 = vld [vmem:[#allocation5 + $0x1c4] ss:$16 sps:$4 sm:$0xff]   ;;  %v6086_v62 = vld [vmem:[#allocation5 + $0x1c0] ss:$16 sps:$4 sm:$0xff]  }
  0x9d   :  { %3722 = vmatpush1.bf16.msra.mxu1 %v6044_v30  ;;  %v6084_v61 = vld [vmem:[#allocation5 + $0x3c4] ss:$16 sps:$4 sm:$0xff]   ;;  %v6087_v63 = vld [vmem:[#allocation5 + $0x3c0] ss:$16 sps:$4 sm:$0xff]  }
  0x9e   :  { %3763 = vmatpush1.bf16.msra.mxu0 %v6045_v31  ;;  %3723 = vmatprep.subr.bf16.mxu1 %v6046_v32  ;;  %v6088_v0 = vld [vmem:[#allocation5 + $0x1e4] ss:$16 sps:$4 sm:$0xff]   ;;  %v6092_v2 = vld [vmem:[#allocation5 + $0x1e0] ss:$16 sps:$4 sm:$0xff]   ;;  %v6127_v31 = vld [vmem:[#allocation5 + $0xa8] ss:$16 sps:$4 sm:$0xff]  }
  0x9f   :  { %3764 = vmatprep.subr.bf16.mxu0 %v6048_v33  ;;  %v6090_v1 = vld [vmem:[#allocation5 + $0x3e4] ss:$16 sps:$4 sm:$0xff]   ;;  %v6093_v3 = vld [vmem:[#allocation5 + $0x3e0] ss:$16 sps:$4 sm:$0xff]   ;;  %v6135_v33 = vld [vmem:[#allocation5 + $0xcc] ss:$16 sps:$4 sm:$0xff]  }
  0xa0   :  { %v6096_v5 = vld [vmem:[#allocation5 + $0x404] ss:$16 sps:$4 sm:$0xff]   ;;  %v6094_v9 = vld [vmem:[#allocation5 + $0x400] ss:$16 sps:$4 sm:$0xff]  }
  0xa1   :  { %3724 = vmatpush1.bf16.msra.mxu1 %v6050_v34  ;;  %v6102_v12 = vld [vmem:[#allocation5 + $0x424] ss:$16 sps:$4 sm:$0xff]   ;;  %v6100_v14 = vld [vmem:[#allocation5 + $0x420] ss:$16 sps:$4 sm:$0xff]  }
  0xa2   :  { %3765 = vmatpush1.bf16.msra.mxu0 %v6051_v35  ;;  %3725 = vmatprep.subr.bf16.mxu1 %v6052_v36  ;;  %v6108_v16 = vld [vmem:[#allocation5 + $0x444] ss:$16 sps:$4 sm:$0xff]   ;;  %v6106_v18 = vld [vmem:[#allocation5 + $0x440] ss:$16 sps:$4 sm:$0xff]  }
  0xa3   :  { %3766 = vmatprep.subr.bf16.mxu0 %v6054_v37  ;;  %v6114_v20 = vld [vmem:[#allocation5 + $0x464] ss:$16 sps:$4 sm:$0xff]   ;;  %v6112_v22 = vld [vmem:[#allocation5 + $0x460] ss:$16 sps:$4 sm:$0xff]   ;;  %v6133_v37 = vld [vmem:[#allocation5 + $0xc8] ss:$16 sps:$4 sm:$0xff]  }
  0xa4   :  { %v6120_v24 = vld [vmem:[#allocation5 + $0x484] ss:$16 sps:$4 sm:$0xff]   ;;  %v6118_v26 = vld [vmem:[#allocation5 + $0x480] ss:$16 sps:$4 sm:$0xff]  }
  0xa5   :  { %3726 = vmatpush1.bf16.msra.mxu1 %v6056_v38  ;;  %v6126_v28 = vld [vmem:[#allocation5 + $0x4a4] ss:$16 sps:$4 sm:$0xff]   ;;  %v6124_v30 = vld [vmem:[#allocation5 + $0x4a0] ss:$16 sps:$4 sm:$0xff]  }
  0xa6   :  { %3767 = vmatpush1.bf16.msra.mxu0 %v6057_v39  ;;  %3727 = vmatprep.subr.bf16.mxu1 %v6058_v40  ;;  %v6132_v32 = vld [vmem:[#allocation5 + $0x4c4] ss:$16 sps:$4 sm:$0xff]   ;;  %v6130_v35 = vld [vmem:[#allocation5 + $0x4c0] ss:$16 sps:$4 sm:$0xff]   ;;  %v6141_v39 = vld [vmem:[#allocation5 + $0xec] ss:$16 sps:$4 sm:$0xff]  }
  0xa7   :  { %3768 = vmatprep.subr.bf16.mxu0 %v6060_v41  ;;  %v120_v34 = vld [vmem:[#allocation2 + $0x28] sm:$0xff]  ;;  %v6139_v41 = vld [vmem:[#allocation5 + $0xe8] ss:$16 sps:$4 sm:$0xff]  }
  0xa8   :  { %v7330_v36 = vpack.c.bf16 %v120_v34, %v120_v34  ;;  %v6138_v38 = vld [vmem:[#allocation5 + $0x4e4] ss:$16 sps:$4 sm:$0xff]   ;;  %v6136_v40 = vld [vmem:[#allocation5 + $0x4e0] ss:$16 sps:$4 sm:$0xff]  }
  0xa9   :  { %3728 = vmatpush1.bf16.msra.mxu1 %v6062_v42  ;;  %v6144_v42 = vld [vmem:[#allocation5 + $0x504] ss:$16 sps:$4 sm:$0xff]   ;;  %v6214_v34 = vld [vmem:[#allocation5 + $0x680] ss:$16 sps:$4 sm:$0xff]  }
  0xaa   :  { %3769 = vmatpush1.bf16.msra.mxu0 %v6063_v43  ;;  %3729 = vmatprep.subr.bf16.mxu1 %v6064_v44  ;;  %v6147_v43 = vld [vmem:[#allocation5 + $0x10c] ss:$16 sps:$4 sm:$0xff]   ;;  %v6142_v44 = vld [vmem:[#allocation5 + $0x500] ss:$16 sps:$4 sm:$0xff]   ;;  %v6150_v46 = vld [vmem:[#allocation5 + $0x524] ss:$16 sps:$4 sm:$0xff]  }
  0xab   :  { %3770 = vmatprep.subr.bf16.mxu0 %v6066_v45  ;;  %v6145_v45 = vld [vmem:[#allocation5 + $0x108] ss:$16 sps:$4 sm:$0xff]  }
  0xad   :  { %3730 = vmatpush1.bf16.msra.mxu1 %v6068_v47  ;;  %v6153_v47 = vld [vmem:[#allocation5 + $0x12c] ss:$16 sps:$4 sm:$0xff]  }
  0xae   :  { %3771 = vmatpush1.bf16.msra.mxu0 %v6069_v50  ;;  %3731 = vmatprep.subr.bf16.mxu1 %v6070_v51  ;;  %v6156_v50 = vld [vmem:[#allocation5 + $0x544] ss:$16 sps:$4 sm:$0xff]   ;;  %v6159_v51 = vld [vmem:[#allocation5 + $0x14c] ss:$16 sps:$4 sm:$0xff]  }
  0xaf   :  { %3772 = vmatprep.subr.bf16.mxu0 %v6072_v53  ;;  %v6154_v53 = vld [vmem:[#allocation5 + $0x540] ss:$16 sps:$4 sm:$0xff]  }
  0xb1   :  { %3732 = vmatpush1.bf16.msra.mxu1 %v6074_v54  ;;  %v6157_v54 = vld [vmem:[#allocation5 + $0x148] ss:$16 sps:$4 sm:$0xff]  }
  0xb2   :  { %3773 = vmatpush1.bf16.msra.mxu0 %v6075_v55  ;;  %3733 = vmatprep.subr.bf16.mxu1 %v6076_v56  ;;  %v6162_v55 = vld [vmem:[#allocation5 + $0x564] ss:$16 sps:$4 sm:$0xff]   ;;  %v6165_v56 = vld [vmem:[#allocation5 + $0x16c] ss:$16 sps:$4 sm:$0xff]  }
  0xb3   :  { %3774 = vmatprep.subr.bf16.mxu0 %v6078_v57  ;;  %v6160_v57 = vld [vmem:[#allocation5 + $0x560] ss:$16 sps:$4 sm:$0xff]  }
  0xb5   :  { %3734 = vmatpush1.bf16.msra.mxu1 %v6080_v58  ;;  %v6163_v58 = vld [vmem:[#allocation5 + $0x168] ss:$16 sps:$4 sm:$0xff]  }
  0xb6   :  { %3775 = vmatpush1.bf16.msra.mxu0 %v6081_v59  ;;  %3735 = vmatprep.subr.bf16.mxu1 %v6082_v60  ;;  %v6168_v59 = vld [vmem:[#allocation5 + $0x584] ss:$16 sps:$4 sm:$0xff]   ;;  %v6171_v60 = vld [vmem:[#allocation5 + $0x18c] ss:$16 sps:$4 sm:$0xff]  }
  0xb7   :  { %3776 = vmatprep.subr.bf16.mxu0 %v6084_v61  ;;  %v6166_v61 = vld [vmem:[#allocation5 + $0x580] ss:$16 sps:$4 sm:$0xff]  }
  0xb9   :  { %3736 = vmatpush1.bf16.msra.mxu1 %v6086_v62  ;;  %v6169_v62 = vld [vmem:[#allocation5 + $0x188] ss:$16 sps:$4 sm:$0xff]  }
  0xba   :  { %3777 = vmatpush1.bf16.msra.mxu0 %v6087_v63  ;;  %3737 = vmatprep.subr.bf16.mxu1 %v6088_v0  ;;  %v6174_v63 = vld [vmem:[#allocation5 + $0x5a4] ss:$16 sps:$4 sm:$0xff]   ;;  %v6177_v0 = vld [vmem:[#allocation5 + $0x1ac] ss:$16 sps:$4 sm:$0xff]  }
  0xbb   :  { %3778 = vmatprep.subr.bf16.mxu0 %v6090_v1  ;;  %v6172_v1 = vld [vmem:[#allocation5 + $0x5a0] ss:$16 sps:$4 sm:$0xff]  }
  0xbd   :  { %3738 = vmatpush1.bf16.msra.mxu1 %v6092_v2  ;;  %v6175_v2 = vld [vmem:[#allocation5 + $0x1a8] ss:$16 sps:$4 sm:$0xff]  }
  0xbe   :  { %3779 = vmatpush1.bf16.msra.mxu0 %v6093_v3  ;;  %4117 = vmatprep.subr.bf16.mxu1 %v6099_v7  ;;  %v6180_v3 = vld [vmem:[#allocation5 + $0x5c4] ss:$16 sps:$4 sm:$0xff]  }
  0xbf   :  { %3789 = vmatprep.subr.bf16.mxu0 %v6096_v5  ;;  %v6178_v5 = vld [vmem:[#allocation5 + $0x5c0] ss:$16 sps:$4 sm:$0xff]   ;;  %v6186_v7 = vld [vmem:[#allocation5 + $0x5e4] ss:$16 sps:$4 sm:$0xff]  }
  0xc0   :  { %3740 = vmatmul.mubr.bf16.vlgmr.msra.gmra.mrb[0].mxu1 %v7323_v8 }
  0xc1   :  { %3781 = vmatmul.mubr.bf16.vlgmr.msra.gmra.mrb[0].mxu0 %v7325_v11  ;;  %4118 = vmatpush1.bf16.msra.mxu1 %v6097_v10  ;;  %v6184_v10 = vld [vmem:[#allocation5 + $0x5e0] ss:$16 sps:$4 sm:$0xff]  }
  0xc2   :  { %3790 = vmatpush1.bf16.msra.mxu0 %v6094_v9  ;;  %4119 = vmatprep.subr.bf16.mxu1 %v6105_v13  ;;  %v6189_v9 = vld [vmem:[#allocation5 + $0x1ec] ss:$16 sps:$4 sm:$0xff]  }
  0xc3   :  { %3791 = vmatprep.subr.bf16.mxu0 %v6102_v12  ;;  %4149 = vmatprep.mubr.bf16.mxu1 %v7317_v48  ;;  %v6148_v48 = vld [vmem:[#allocation5 + $0x520] ss:$16 sps:$4 sm:$0xff]   ;;  %v6187_v12 = vld [vmem:[#allocation5 + $0x1e8] ss:$16 sps:$4 sm:$0xff]  }
  0xc4   :  { %3821 = vmatprep.mubr.bf16.mxu0 %v7330_v36  ;;  %v119_v13 = vld [vmem:[#allocation2 + $0x20] sm:$0xff] }
  0xc5   :  { %4120 = vmatpush1.bf16.msra.mxu1 %v6103_v15  ;;  %v6195_v15 = vld [vmem:[#allocation5 + $0x20c] ss:$16 sps:$4 sm:$0xff]  }
  0xc6   :  { %3792 = vmatpush1.bf16.msra.mxu0 %v6100_v14  ;;  %4121 = vmatprep.subr.bf16.mxu1 %v6111_v17  ;;  %v6192_v14 = vld [vmem:[#allocation5 + $0x604] ss:$16 sps:$4 sm:$0xff]   ;;  %v6190_v17 = vld [vmem:[#allocation5 + $0x600] ss:$16 sps:$4 sm:$0xff]  }
  0xc7   :  { %3793 = vmatprep.subr.bf16.mxu0 %v6108_v16  ;;  %v7333_v16 = vpack.c.bf16 %v119_v13, %v119_v13  ;;  %v6274_v13 = vld [vmem:[#allocation5 + $0x7c0] ss:$16 sps:$4 sm:$0xff]  }
  0xc9   :  { %4122 = vmatpush1.bf16.msra.mxu1 %v6109_v19  ;;  %v6198_v19 = vld [vmem:[#allocation5 + $0x624] ss:$16 sps:$4 sm:$0xff]  }
  0xca   :  { %3794 = vmatpush1.bf16.msra.mxu0 %v6106_v18  ;;  %4123 = vmatprep.subr.bf16.mxu1 %v6117_v21  ;;  %v6193_v18 = vld [vmem:[#allocation5 + $0x208] ss:$16 sps:$4 sm:$0xff]   ;;  %v122_v21 = vld [vmem:[#allocation2 + $0x38] sm:$0xff] }
  0xcb   :  { %3795 = vmatprep.subr.bf16.mxu0 %v6114_v20  ;;  %v6201_v20 = vld [vmem:[#allocation5 + $0x22c] ss:$16 sps:$4 sm:$0xff]  }
  0xcd   :  { %4124 = vmatpush1.bf16.msra.mxu1 %v6115_v23  ;;  %v7337_v23 = vpack.c.bf16 %v122_v21, %v122_v21  ;;  %v121_v21 = vld [vmem:[#allocation2 + $0x30] sm:$0xff] }
  0xce   :  { %3796 = vmatpush1.bf16.msra.mxu0 %v6112_v22  ;;  %4125 = vmatprep.subr.bf16.mxu1 %v6123_v25  ;;  %v6196_v22 = vld [vmem:[#allocation5 + $0x620] ss:$16 sps:$4 sm:$0xff]   ;;  %v6204_v25 = vld [vmem:[#allocation5 + $0x644] ss:$16 sps:$4 sm:$0xff]  }
  0xcf   :  { %3797 = vmatprep.subr.bf16.mxu0 %v6120_v24  ;;  %v6199_v24 = vld [vmem:[#allocation5 + $0x228] ss:$16 sps:$4 sm:$0xff]  }
  0xd1   :  { %4126 = vmatpush1.bf16.msra.mxu1 %v6121_v27  ;;  %v6202_v27 = vld [vmem:[#allocation5 + $0x640] ss:$16 sps:$4 sm:$0xff]  }
  0xd2   :  { %3798 = vmatpush1.bf16.msra.mxu0 %v6118_v26  ;;  %4127 = vmatprep.subr.bf16.mxu1 %v6129_v29  ;;  %v6207_v26 = vld [vmem:[#allocation5 + $0x24c] ss:$16 sps:$4 sm:$0xff]   ;;  %v6210_v29 = vld [vmem:[#allocation5 + $0x664] ss:$16 sps:$4 sm:$0xff]  }
  0xd3   :  { %3799 = vmatprep.subr.bf16.mxu0 %v6126_v28  ;;  %v6205_v28 = vld [vmem:[#allocation5 + $0x248] ss:$16 sps:$4 sm:$0xff]  }
  0xd5   :  { %4128 = vmatpush1.bf16.msra.mxu1 %v6127_v31  ;;  %v6211_v31 = vld [vmem:[#allocation5 + $0x268] ss:$16 sps:$4 sm:$0xff]  }
  0xd6   :  { %3800 = vmatpush1.bf16.msra.mxu0 %v6124_v30  ;;  %4129 = vmatprep.subr.bf16.mxu1 %v6135_v33  ;;  %v6208_v30 = vld [vmem:[#allocation5 + $0x660] ss:$16 sps:$4 sm:$0xff]   ;;  %v6219_v33 = vld [vmem:[#allocation5 + $0x28c] ss:$16 sps:$4 sm:$0xff]  }
  0xd7   :  { %3801 = vmatprep.subr.bf16.mxu0 %v6132_v32  ;;  %v6216_v32 = vld [vmem:[#allocation5 + $0x684] ss:$16 sps:$4 sm:$0xff]  }
  0xd9   :  { %4130 = vmatpush1.bf16.msra.mxu1 %v6133_v37  ;;  %v6225_v37 = vld [vmem:[#allocation5 + $0x2ac] ss:$16 sps:$4 sm:$0xff]  }
  0xda   :  { %3802 = vmatpush1.bf16.msra.mxu0 %v6130_v35  ;;  %4131 = vmatprep.subr.bf16.mxu1 %v6141_v39  ;;  %v6217_v35 = vld [vmem:[#allocation5 + $0x288] ss:$16 sps:$4 sm:$0xff]  }
  0xdb   :  { %3803 = vmatprep.subr.bf16.mxu0 %v6138_v38  ;;  %v6220_v38 = vld [vmem:[#allocation5 + $0x6a0] ss:$16 sps:$4 sm:$0xff]   ;;  %v6223_v39 = vld [vmem:[#allocation5 + $0x2a8] ss:$16 sps:$4 sm:$0xff]  }
  0xdd   :  { %4132 = vmatpush1.bf16.msra.mxu1 %v6139_v41  ;;  %v6231_v41 = vld [vmem:[#allocation5 + $0x2cc] ss:$16 sps:$4 sm:$0xff]  }
  0xde   :  { %3804 = vmatpush1.bf16.msra.mxu0 %v6136_v40  ;;  %4133 = vmatprep.subr.bf16.mxu1 %v6147_v43  ;;  %v6228_v40 = vld [vmem:[#allocation5 + $0x6c4] ss:$16 sps:$4 sm:$0xff]   ;;  %v6229_v43 = vld [vmem:[#allocation5 + $0x2c8] ss:$16 sps:$4 sm:$0xff]  }
  0xdf   :  { %3805 = vmatprep.subr.bf16.mxu0 %v6144_v42  ;;  %v6226_v42 = vld [vmem:[#allocation5 + $0x6c0] ss:$16 sps:$4 sm:$0xff]  }
  0xe1   :  { %4134 = vmatpush1.bf16.msra.mxu1 %v6145_v45  ;;  %v6237_v45 = vld [vmem:[#allocation5 + $0x2ec] ss:$16 sps:$4 sm:$0xff]  }
  0xe2   :  { %3806 = vmatpush1.bf16.msra.mxu0 %v6142_v44  ;;  %4135 = vmatprep.subr.bf16.mxu1 %v6153_v47  ;;  %v6234_v44 = vld [vmem:[#allocation5 + $0x6e4] ss:$16 sps:$4 sm:$0xff]   ;;  %v6235_v47 = vld [vmem:[#allocation5 + $0x2e8] ss:$16 sps:$4 sm:$0xff]  }
  0xe3   :  { %3807 = vmatprep.subr.bf16.mxu0 %v6150_v46  ;;  %v6232_v46 = vld [vmem:[#allocation5 + $0x6e0] ss:$16 sps:$4 sm:$0xff]  }
  0xe5   :  { %4136 = vmatpush1.bf16.msra.mxu1 %v6151_v49  ;;  %v6243_v49 = vld [vmem:[#allocation5 + $0x30c] ss:$16 sps:$4 sm:$0xff]  }
  0xe6   :  { %3808 = vmatpush1.bf16.msra.mxu0 %v6148_v48  ;;  %4137 = vmatprep.subr.bf16.mxu1 %v6159_v51  ;;  %v6240_v48 = vld [vmem:[#allocation5 + $0x704] ss:$16 sps:$4 sm:$0xff]   ;;  %v6241_v51 = vld [vmem:[#allocation5 + $0x308] ss:$16 sps:$4 sm:$0xff]  }
  0xe7   :  { %3809 = vmatprep.subr.bf16.mxu0 %v6156_v50  ;;  %v6238_v50 = vld [vmem:[#allocation5 + $0x700] ss:$16 sps:$4 sm:$0xff]  }
  0xe9   :  { %4138 = vmatpush1.bf16.msra.mxu1 %v6157_v54  ;;  %v6249_v54 = vld [vmem:[#allocation5 + $0x32c] ss:$16 sps:$4 sm:$0xff]  }
  0xea   :  { %3810 = vmatpush1.bf16.msra.mxu0 %v6154_v53  ;;  %4139 = vmatprep.subr.bf16.mxu1 %v6165_v56  ;;  %v6246_v53 = vld [vmem:[#allocation5 + $0x724] ss:$16 sps:$4 sm:$0xff]   ;;  %v6247_v56 = vld [vmem:[#allocation5 + $0x328] ss:$16 sps:$4 sm:$0xff]  }
  0xeb   :  { %3811 = vmatprep.subr.bf16.mxu0 %v6162_v55  ;;  %v6244_v55 = vld [vmem:[#allocation5 + $0x720] ss:$16 sps:$4 sm:$0xff]  }
  0xed   :  { %4140 = vmatpush1.bf16.msra.mxu1 %v6163_v58  ;;  %v6255_v58 = vld [vmem:[#allocation5 + $0x34c] ss:$16 sps:$4 sm:$0xff]  }
  0xee   :  { %3812 = vmatpush1.bf16.msra.mxu0 %v6160_v57  ;;  %4141 = vmatprep.subr.bf16.mxu1 %v6171_v60  ;;  %v6252_v57 = vld [vmem:[#allocation5 + $0x744] ss:$16 sps:$4 sm:$0xff]   ;;  %v6253_v60 = vld [vmem:[#allocation5 + $0x348] ss:$16 sps:$4 sm:$0xff]  }
  0xef   :  { %3813 = vmatprep.subr.bf16.mxu0 %v6168_v59  ;;  %v6250_v59 = vld [vmem:[#allocation5 + $0x740] ss:$16 sps:$4 sm:$0xff]  }
  0xf1   :  { %4142 = vmatpush1.bf16.msra.mxu1 %v6169_v62  ;;  %v6261_v62 = vld [vmem:[#allocation5 + $0x36c] ss:$16 sps:$4 sm:$0xff]  }
  0xf2   :  { %3814 = vmatpush1.bf16.msra.mxu0 %v6166_v61  ;;  %4143 = vmatprep.subr.bf16.mxu1 %v6177_v0  ;;  %v6258_v61 = vld [vmem:[#allocation5 + $0x764] ss:$16 sps:$4 sm:$0xff]   ;;  %v6259_v0 = vld [vmem:[#allocation5 + $0x368] ss:$16 sps:$4 sm:$0xff]  }
  0xf3   :  { %3815 = vmatprep.subr.bf16.mxu0 %v6174_v63  ;;  %v6256_v63 = vld [vmem:[#allocation5 + $0x760] ss:$16 sps:$4 sm:$0xff]  }
  0xf5   :  { %4144 = vmatpush1.bf16.msra.mxu1 %v6175_v2  ;;  %v6267_v2 = vld [vmem:[#allocation5 + $0x38c] ss:$16 sps:$4 sm:$0xff]  }
  0xf6   :  { %3816 = vmatpush1.bf16.msra.mxu0 %v6172_v1  ;;  %4145 = vmatprep.subr.bf16.mxu1 %v6183_v4  ;;  %v6264_v1 = vld [vmem:[#allocation5 + $0x784] ss:$16 sps:$4 sm:$0xff]   ;;  %v6265_v4 = vld [vmem:[#allocation5 + $0x388] ss:$16 sps:$4 sm:$0xff]  }
  0xf7   :  { %3817 = vmatprep.subr.bf16.mxu0 %v6180_v3  ;;  %v6262_v3 = vld [vmem:[#allocation5 + $0x780] ss:$16 sps:$4 sm:$0xff]  }
  0xf9   :  { %4146 = vmatpush1.bf16.msra.mxu1 %v6181_v6  ;;  %v6273_v6 = vld [vmem:[#allocation5 + $0x3ac] ss:$16 sps:$4 sm:$0xff]  }
  0xfa   :  { %3818 = vmatpush1.bf16.msra.mxu0 %v6178_v5  ;;  %4147 = vmatprep.subr.bf16.mxu1 %v6189_v9  ;;  %v6270_v5 = vld [vmem:[#allocation5 + $0x7a4] ss:$16 sps:$4 sm:$0xff]   ;;  %v6271_v9 = vld [vmem:[#allocation5 + $0x3a8] ss:$16 sps:$4 sm:$0xff]  }
  0xfb   :  { %3819 = vmatprep.subr.bf16.mxu0 %v6186_v7  ;;  %v6268_v7 = vld [vmem:[#allocation5 + $0x7a0] ss:$16 sps:$4 sm:$0xff]  }
  0xfd   :  { %4148 = vmatpush1.bf16.msra.mxu1 %v6187_v12  ;;  %v6279_v12 = vld [vmem:[#allocation5 + $0x3cc] ss:$16 sps:$4 sm:$0xff]  }
  0xfe   :  { %3820 = vmatpush1.bf16.msra.mxu0 %v6184_v10  ;;  %4158 = vmatprep.subr.bf16.mxu1 %v6195_v15  ;;  %v6276_v10 = vld [vmem:[#allocation5 + $0x7c4] ss:$16 sps:$4 sm:$0xff]  }
  0xff   :  { %3830 = vmatprep.subr.bf16.mxu0 %v6192_v14  ;;  %v6277_v14 = vld [vmem:[#allocation5 + $0x3c8] ss:$16 sps:$4 sm:$0xff]   ;;  %v6282_v15 = vld [vmem:[#allocation5 + $0x7e4] ss:$16 sps:$4 sm:$0xff]  }
 0x100   :  { %4150 = vmatmul.mubr.bf16.vlgmr.msra.gmra.mrb[4].mxu1 %v7323_v8  ;;  %v6213_v8 = vld [vmem:[#allocation5 + $0x26c] ss:$16 sps:$4 sm:$0xff]  }
 0x101   :  { %3822 = vmatmul.mubr.bf16.vlgmr.msra.gmra.mrb[0].mxu0 %v7333_v16  ;;  %4159 = vmatpush1.bf16.msra.mxu1 %v6193_v18  ;;  %v6280_v18 = vld [vmem:[#allocation5 + $0x7e0] ss:$16 sps:$4 sm:$0xff]  }
 0x102   :  { %3831 = vmatpush1.bf16.msra.mxu0 %v6190_v17  ;;  %4160 = vmatprep.subr.bf16.mxu1 %v6201_v20  ;;  %v6285_v17 = vld [vmem:[#allocation5 + $0x3ec] ss:$16 sps:$4 sm:$0xff]   ;;  %v6288_v20 = vld [vmem:[#allocation5 + $0x804] ss:$16 sps:$4 sm:$0xff]  }
 0x103   :  { %3832 = vmatprep.subr.bf16.mxu0 %v6198_v19  ;;  %3862 = vmatprep.mubr.bf16.mxu0 %v7337_v23  ;;  %v6283_v19 = vld [vmem:[#allocation5 + $0x3e8] ss:$16 sps:$4 sm:$0xff]  }
 0x104   :  { %4190 = vmatprep.mubr.bf16.mxu1 %v7319_v52  ;;  %v6222_v52 = vld [vmem:[#allocation5 + $0x6a4] ss:$16 sps:$4 sm:$0xff]  }
 0x105   :  { %4161 = vmatpush1.bf16.msra.mxu1 %v6199_v24  ;;  %v6286_v24 = vld [vmem:[#allocation5 + $0x800] ss:$16 sps:$4 sm:$0xff]  }
 0x106   :  { %3833 = vmatpush1.bf16.msra.mxu0 %v6196_v22  ;;  %4162 = vmatprep.subr.bf16.mxu1 %v6207_v26  ;;  %v6291_v22 = vld [vmem:[#allocation5 + $0x40c] ss:$16 sps:$4 sm:$0xff]   ;;  %v124_v26 = vld [vmem:[#allocation2 + $0x48] sm:$0xff] }
 0x107   :  { %3834 = vmatprep.subr.bf16.mxu0 %v6204_v25  ;;  %v7341_v25 = vpack.c.bf16 %v121_v21, %v121_v21  ;;  %v6373_v21 = vld [vmem:[#allocation5 + $0x5c8] ss:$16 sps:$4 sm:$0xff]  }
 0x109   :  { %4163 = vmatpush1.bf16.msra.mxu1 %v6205_v28  ;;  %v6294_v28 = vld [vmem:[#allocation5 + $0x824] ss:$16 sps:$4 sm:$0xff]  }
 0x10a   :  { %3835 = vmatpush1.bf16.msra.mxu0 %v6202_v27  ;;  %4164 = vmatprep.subr.bf16.mxu1 %v6213_v8  ;;  %v6289_v27 = vld [vmem:[#allocation5 + $0x408] ss:$16 sps:$4 sm:$0xff]   ;;  %v7343_v8 = vpack.c.bf16 %v124_v26, %v124_v26  ;;  %v6376_v26 = vld [vmem:[#allocation5 + $0x9e0] ss:$16 sps:$4 sm:$0xff]  }
 0x10b   :  { %3836 = vmatprep.subr.bf16.mxu0 %v6210_v29  ;;  %v6297_v29 = vld [vmem:[#allocation5 + $0x42c] ss:$16 sps:$4 sm:$0xff]  }
 0x10d   :  { %4165 = vmatpush1.bf16.msra.mxu1 %v6211_v31  ;;  %v6295_v31 = vld [vmem:[#allocation5 + $0x428] ss:$16 sps:$4 sm:$0xff]  }
 0x10e   :  { %3837 = vmatpush1.bf16.msra.mxu0 %v6208_v30  ;;  %4166 = vmatprep.subr.bf16.mxu1 %v6219_v33  ;;  %v6292_v30 = vld [vmem:[#allocation5 + $0x820] ss:$16 sps:$4 sm:$0xff]   ;;  %v6303_v33 = vld [vmem:[#allocation5 + $0x44c] ss:$16 sps:$4 sm:$0xff]  }
 0x10f   :  { %3838 = vmatprep.subr.bf16.mxu0 %v6216_v32  ;;  %v6300_v32 = vld [vmem:[#allocation5 + $0x844] ss:$16 sps:$4 sm:$0xff]  }
 0x111   :  { %4167 = vmatpush1.bf16.msra.mxu1 %v6217_v35  ;;  %v6301_v35 = vld [vmem:[#allocation5 + $0x448] ss:$16 sps:$4 sm:$0xff]  }
 0x112   :  { %3839 = vmatpush1.bf16.msra.mxu0 %v6214_v34  ;;  %4168 = vmatprep.subr.bf16.mxu1 %v6225_v37  ;;  %v6298_v34 = vld [vmem:[#allocation5 + $0x840] ss:$16 sps:$4 sm:$0xff]  }
 0x113   :  { %3840 = vmatprep.subr.bf16.mxu0 %v6222_v52  ;;  %v6306_v52 = vld [vmem:[#allocation5 + $0x864] ss:$16 sps:$4 sm:$0xff]   ;;  %v6304_v37 = vld [vmem:[#allocation5 + $0x860] ss:$16 sps:$4 sm:$0xff]  }
 0x115   :  { %4169 = vmatpush1.bf16.msra.mxu1 %v6223_v39  ;;  %v6312_v39 = vld [vmem:[#allocation5 + $0x884] ss:$16 sps:$4 sm:$0xff]  }
 0x116   :  { %3841 = vmatpush1.bf16.msra.mxu0 %v6220_v38  ;;  %4170 = vmatprep.subr.bf16.mxu1 %v6231_v41  ;;  %v6307_v38 = vld [vmem:[#allocation5 + $0x468] ss:$16 sps:$4 sm:$0xff]   ;;  %v6310_v41 = vld [vmem:[#allocation5 + $0x880] ss:$16 sps:$4 sm:$0xff]  }
 0x117   :  { %3842 = vmatprep.subr.bf16.mxu0 %v6228_v40  ;;  %v6315_v40 = vld [vmem:[#allocation5 + $0x48c] ss:$16 sps:$4 sm:$0xff]  }
 0x119   :  { %4171 = vmatpush1.bf16.msra.mxu1 %v6229_v43  ;;  %v6321_v43 = vld [vmem:[#allocation5 + $0x4ac] ss:$16 sps:$4 sm:$0xff]  }
 0x11a   :  { %3843 = vmatpush1.bf16.msra.mxu0 %v6226_v42  ;;  %4172 = vmatprep.subr.bf16.mxu1 %v6237_v45  ;;  %v6318_v42 = vld [vmem:[#allocation5 + $0x8a4] ss:$16 sps:$4 sm:$0xff]   ;;  %v6319_v45 = vld [vmem:[#allocation5 + $0x4a8] ss:$16 sps:$4 sm:$0xff]  }
 0x11b   :  { %3844 = vmatprep.subr.bf16.mxu0 %v6234_v44  ;;  %v6316_v44 = vld [vmem:[#allocation5 + $0x8a0] ss:$16 sps:$4 sm:$0xff]  }
 0x11d   :  { %4173 = vmatpush1.bf16.msra.mxu1 %v6235_v47  ;;  %v6327_v47 = vld [vmem:[#allocation5 + $0x4cc] ss:$16 sps:$4 sm:$0xff]  }
 0x11e   :  { %3845 = vmatpush1.bf16.msra.mxu0 %v6232_v46  ;;  %4174 = vmatprep.subr.bf16.mxu1 %v6243_v49  ;;  %v6324_v46 = vld [vmem:[#allocation5 + $0x8c4] ss:$16 sps:$4 sm:$0xff]   ;;  %v6325_v49 = vld [vmem:[#allocation5 + $0x4c8] ss:$16 sps:$4 sm:$0xff]  }
 0x11f   :  { %3846 = vmatprep.subr.bf16.mxu0 %v6240_v48  ;;  %v6322_v48 = vld [vmem:[#allocation5 + $0x8c0] ss:$16 sps:$4 sm:$0xff]  }
 0x121   :  { %4175 = vmatpush1.bf16.msra.mxu1 %v6241_v51  ;;  %v6333_v51 = vld [vmem:[#allocation5 + $0x4ec] ss:$16 sps:$4 sm:$0xff]  }
 0x122   :  { %3847 = vmatpush1.bf16.msra.mxu0 %v6238_v50  ;;  %4176 = vmatprep.subr.bf16.mxu1 %v6249_v54  ;;  %v6330_v50 = vld [vmem:[#allocation5 + $0x8e4] ss:$16 sps:$4 sm:$0xff]   ;;  %v6331_v54 = vld [vmem:[#allocation5 + $0x4e8] ss:$16 sps:$4 sm:$0xff]  }
 0x123   :  { %3848 = vmatprep.subr.bf16.mxu0 %v6246_v53  ;;  %v6328_v53 = vld [vmem:[#allocation5 + $0x8e0] ss:$16 sps:$4 sm:$0xff]  }
 0x125   :  { %4177 = vmatpush1.bf16.msra.mxu1 %v6247_v56  ;;  %v6339_v56 = vld [vmem:[#allocation5 + $0x50c] ss:$16 sps:$4 sm:$0xff]  }
 0x126   :  { %3849 = vmatpush1.bf16.msra.mxu0 %v6244_v55  ;;  %4178 = vmatprep.subr.bf16.mxu1 %v6255_v58  ;;  %v6336_v55 = vld [vmem:[#allocation5 + $0x904] ss:$16 sps:$4 sm:$0xff]   ;;  %v6337_v58 = vld [vmem:[#allocation5 + $0x508] ss:$16 sps:$4 sm:$0xff]  }
 0x127   :  { %3850 = vmatprep.subr.bf16.mxu0 %v6252_v57  ;;  %v6334_v57 = vld [vmem:[#allocation5 + $0x900] ss:$16 sps:$4 sm:$0xff]  }
 0x129   :  { %4179 = vmatpush1.bf16.msra.mxu1 %v6253_v60  ;;  %v6345_v60 = vld [vmem:[#allocation5 + $0x52c] ss:$16 sps:$4 sm:$0xff]  }
 0x12a   :  { %3851 = vmatpush1.bf16.msra.mxu0 %v6250_v59  ;;  %4180 = vmatprep.subr.bf16.mxu1 %v6261_v62  ;;  %v6342_v59 = vld [vmem:[#allocation5 + $0x924] ss:$16 sps:$4 sm:$0xff]   ;;  %v6343_v62 = vld [vmem:[#allocation5 + $0x528] ss:$16 sps:$4 sm:$0xff]  }
 0x12b   :  { %3852 = vmatprep.subr.bf16.mxu0 %v6258_v61  ;;  %v6340_v61 = vld [vmem:[#allocation5 + $0x920] ss:$16 sps:$4 sm:$0xff]  }
 0x12d   :  { %4181 = vmatpush1.bf16.msra.mxu1 %v6259_v0  ;;  %v6351_v0 = vld [vmem:[#allocation5 + $0x54c] ss:$16 sps:$4 sm:$0xff]  }
 0x12e   :  { %3853 = vmatpush1.bf16.msra.mxu0 %v6256_v63  ;;  %4182 = vmatprep.subr.bf16.mxu1 %v6267_v2  ;;  %v6348_v63 = vld [vmem:[#allocation5 + $0x944] ss:$16 sps:$4 sm:$0xff]   ;;  %v6349_v2 = vld [vmem:[#allocation5 + $0x548] ss:$16 sps:$4 sm:$0xff]  }
 0x12f   :  { %3854 = vmatprep.subr.bf16.mxu0 %v6264_v1  ;;  %v6346_v1 = vld [vmem:[#allocation5 + $0x940] ss:$16 sps:$4 sm:$0xff]  }
 0x131   :  { %4183 = vmatpush1.bf16.msra.mxu1 %v6265_v4  ;;  %v6357_v4 = vld [vmem:[#allocation5 + $0x56c] ss:$16 sps:$4 sm:$0xff]  }
 0x132   :  { %3855 = vmatpush1.bf16.msra.mxu0 %v6262_v3  ;;  %4184 = vmatprep.subr.bf16.mxu1 %v6273_v6  ;;  %v6354_v3 = vld [vmem:[#allocation5 + $0x964] ss:$16 sps:$4 sm:$0xff]   ;;  %v6355_v6 = vld [vmem:[#allocation5 + $0x568] ss:$16 sps:$4 sm:$0xff]  }
 0x133   :  { %3856 = vmatprep.subr.bf16.mxu0 %v6270_v5  ;;  %v6352_v5 = vld [vmem:[#allocation5 + $0x960] ss:$16 sps:$4 sm:$0xff]  }
 0x135   :  { %4185 = vmatpush1.bf16.msra.mxu1 %v6271_v9  ;;  %v6363_v9 = vld [vmem:[#allocation5 + $0x58c] ss:$16 sps:$4 sm:$0xff]  }
 0x136   :  { %3857 = vmatpush1.bf16.msra.mxu0 %v6268_v7  ;;  %4186 = vmatprep.subr.bf16.mxu1 %v6279_v12  ;;  %v6360_v7 = vld [vmem:[#allocation5 + $0x984] ss:$16 sps:$4 sm:$0xff]   ;;  %v6361_v12 = vld [vmem:[#allocation5 + $0x588] ss:$16 sps:$4 sm:$0xff]  }
 0x137   :  { %3858 = vmatprep.subr.bf16.mxu0 %v6276_v10  ;;  %v6358_v10 = vld [vmem:[#allocation5 + $0x980] ss:$16 sps:$4 sm:$0xff]  }
 0x139   :  { %4187 = vmatpush1.bf16.msra.mxu1 %v6277_v14  ;;  %v6369_v14 = vld [vmem:[#allocation5 + $0x5ac] ss:$16 sps:$4 sm:$0xff]  }
 0x13a   :  { %3859 = vmatpush1.bf16.msra.mxu0 %v6274_v13  ;;  %4188 = vmatprep.subr.bf16.mxu1 %v6285_v17  ;;  %v6366_v13 = vld [vmem:[#allocation5 + $0x9a4] ss:$16 sps:$4 sm:$0xff]   ;;  %v6367_v17 = vld [vmem:[#allocation5 + $0x5a8] ss:$16 sps:$4 sm:$0xff]  }
 0x13b   :  { %3860 = vmatprep.subr.bf16.mxu0 %v6282_v15  ;;  %v6364_v15 = vld [vmem:[#allocation5 + $0x9a0] ss:$16 sps:$4 sm:$0xff]  }
 0x13d   :  { %4189 = vmatpush1.bf16.msra.mxu1 %v6283_v19  ;;  %v6375_v19 = vld [vmem:[#allocation5 + $0x5cc] ss:$16 sps:$4 sm:$0xff]  }
 0x13e   :  { %3861 = vmatpush1.bf16.msra.mxu0 %v6280_v18  ;;  %4199 = vmatprep.subr.bf16.mxu1 %v6291_v22  ;;  %v6372_v18 = vld [vmem:[#allocation5 + $0x9c4] ss:$16 sps:$4 sm:$0xff]  }
 0x13f   :  { %3871 = vmatprep.subr.bf16.mxu0 %v6288_v20  ;;  %v6370_v20 = vld [vmem:[#allocation5 + $0x9c0] ss:$16 sps:$4 sm:$0xff]   ;;  %v6378_v22 = vld [vmem:[#allocation5 + $0x9e4] ss:$16 sps:$4 sm:$0xff]  }
 0x140   :  { %4191 = vmatmul.mubr.bf16.vlgmr.msra.gmra.mrb[4].mxu1 %v7325_v11  ;;  %v6309_v11 = vld [vmem:[#allocation5 + $0x46c] ss:$16 sps:$4 sm:$0xff]  }
 0x141   :  { %3863 = vmatmul.mubr.bf16.vlgmr.msra.gmra.mrb[0].mxu0 %v7341_v25  ;;  %4200 = vmatpush1.bf16.msra.mxu1 %v6289_v27  ;;  %v6379_v27 = vld [vmem:[#allocation5 + $0x5e8] ss:$16 sps:$4 sm:$0xff]  }
 0x142   :  { %3872 = vmatpush1.bf16.msra.mxu0 %v6286_v24  ;;  %4201 = vmatprep.subr.bf16.mxu1 %v6297_v29  ;;  %v6381_v24 = vld [vmem:[#allocation5 + $0x5ec] ss:$16 sps:$4 sm:$0xff]   ;;  %v6384_v29 = vld [vmem:[#allocation5 + $0xa04] ss:$16 sps:$4 sm:$0xff]  }
 0x143   :  { %3873 = vmatprep.subr.bf16.mxu0 %v6294_v28  ;;  %3903 = vmatprep.mubr.bf16.mxu0 %v7343_v8  ;;  %v123_v28 = vld [vmem:[#allocation2 + $0x40] sm:$0xff] }
 0x144   :  { %4231 = vmatprep.mubr.bf16.mxu1 %v7330_v36  ;;  %v6313_v36 = vld [vmem:[#allocation5 + $0x488] ss:$16 sps:$4 sm:$0xff]  }
 0x145   :  { %4202 = vmatpush1.bf16.msra.mxu1 %v6295_v31  ;;  %v6382_v31 = vld [vmem:[#allocation5 + $0xa00] ss:$16 sps:$4 sm:$0xff]  }
 0x146   :  { %3874 = vmatpush1.bf16.msra.mxu0 %v6292_v30  ;;  %4203 = vmatprep.subr.bf16.mxu1 %v6303_v33  ;;  %v6387_v30 = vld [vmem:[#allocation5 + $0x60c] ss:$16 sps:$4 sm:$0xff]   ;;  %v126_v33 = vld [vmem:[#allocation2 + $0x58] sm:$0xff] }
 0x147   :  { %3875 = vmatprep.subr.bf16.mxu0 %v6300_v32  ;;  %v7349_v32 = vpack.c.bf16 %v123_v28, %v123_v28  ;;  %v6460_v28 = vld [vmem:[#allocation5 + $0xba0] ss:$16 sps:$4 sm:$0xff]  }
 0x149   :  { %4204 = vmatpush1.bf16.msra.mxu1 %v6301_v35  ;;  %v6390_v35 = vld [vmem:[#allocation5 + $0xa24] ss:$16 sps:$4 sm:$0xff]  }
 0x14a   :  { %3876 = vmatpush1.bf16.msra.mxu0 %v6298_v34  ;;  %4205 = vmatprep.subr.bf16.mxu1 %v6309_v11  ;;  %v6385_v34 = vld [vmem:[#allocation5 + $0x608] ss:$16 sps:$4 sm:$0xff]   ;;  %v7351_v11 = vpack.c.bf16 %v126_v33, %v126_v33  ;;  %v6466_v33 = vld [vmem:[#allocation5 + $0xbc0] ss:$16 sps:$4 sm:$0xff]  }
 0x14b   :  { %3877 = vmatprep.subr.bf16.mxu0 %v6306_v52  ;;  %v6393_v52 = vld [vmem:[#allocation5 + $0x62c] ss:$16 sps:$4 sm:$0xff]  }
 0x14d   :  { %4206 = vmatpush1.bf16.msra.mxu1 %v6307_v38  ;;  %v6391_v38 = vld [vmem:[#allocation5 + $0x628] ss:$16 sps:$4 sm:$0xff]  }
 0x14e   :  { %3878 = vmatpush1.bf16.msra.mxu0 %v6304_v37  ;;  %4207 = vmatprep.subr.bf16.mxu1 %v6315_v40  ;;  %v6388_v37 = vld [vmem:[#allocation5 + $0xa20] ss:$16 sps:$4 sm:$0xff]   ;;  %v6399_v40 = vld [vmem:[#allocation5 + $0x64c] ss:$16 sps:$4 sm:$0xff]  }
 0x14f   :  { %3879 = vmatprep.subr.bf16.mxu0 %v6312_v39  ;;  %v6396_v39 = vld [vmem:[#allocation5 + $0xa44] ss:$16 sps:$4 sm:$0xff]  }
 0x151   :  { %4208 = vmatpush1.bf16.msra.mxu1 %v6313_v36  ;;  %v6397_v36 = vld [vmem:[#allocation5 + $0x648] ss:$16 sps:$4 sm:$0xff]  }
 0x152   :  { %3880 = vmatpush1.bf16.msra.mxu0 %v6310_v41  ;;  %4209 = vmatprep.subr.bf16.mxu1 %v6321_v43  ;;  %v6394_v41 = vld [vmem:[#allocation5 + $0xa40] ss:$16 sps:$4 sm:$0xff]  }
 0x153   :  { %3881 = vmatprep.subr.bf16.mxu0 %v6318_v42  ;;  %v6402_v42 = vld [vmem:[#allocation5 + $0xa64] ss:$16 sps:$4 sm:$0xff]   ;;  %v6400_v43 = vld [vmem:[#allocation5 + $0xa60] ss:$16 sps:$4 sm:$0xff]  }
 0x155   :  { %4210 = vmatpush1.bf16.msra.mxu1 %v6319_v45  ;;  %v6408_v45 = vld [vmem:[#allocation5 + $0xa84] ss:$16 sps:$4 sm:$0xff]  }
 0x156   :  { %3882 = vmatpush1.bf16.msra.mxu0 %v6316_v44  ;;  %4211 = vmatprep.subr.bf16.mxu1 %v6327_v47  ;;  %v6403_v44 = vld [vmem:[#allocation5 + $0x668] ss:$16 sps:$4 sm:$0xff]   ;;  %v6406_v47 = vld [vmem:[#allocation5 + $0xa80] ss:$16 sps:$4 sm:$0xff]  }
 0x157   :  { %3883 = vmatprep.subr.bf16.mxu0 %v6324_v46  ;;  %v6411_v46 = vld [vmem:[#allocation5 + $0x68c] ss:$16 sps:$4 sm:$0xff]  }
 0x159   :  { %4212 = vmatpush1.bf16.msra.mxu1 %v6325_v49  ;;  %v6417_v49 = vld [vmem:[#allocation5 + $0x6ac] ss:$16 sps:$4 sm:$0xff]  }
 0x15a   :  { %3884 = vmatpush1.bf16.msra.mxu0 %v6322_v48  ;;  %4213 = vmatprep.subr.bf16.mxu1 %v6333_v51  ;;  %v6414_v48 = vld [vmem:[#allocation5 + $0xaa4] ss:$16 sps:$4 sm:$0xff]   ;;  %v6415_v51 = vld [vmem:[#allocation5 + $0x6a8] ss:$16 sps:$4 sm:$0xff]  }
 0x15b   :  { %3885 = vmatprep.subr.bf16.mxu0 %v6330_v50  ;;  %v6412_v50 = vld [vmem:[#allocation5 + $0xaa0] ss:$16 sps:$4 sm:$0xff]  }
 0x15d   :  { %4214 = vmatpush1.bf16.msra.mxu1 %v6331_v54  ;;  %v6423_v54 = vld [vmem:[#allocation5 + $0x6cc] ss:$16 sps:$4 sm:$0xff]  }
 0x15e   :  { %3886 = vmatpush1.bf16.msra.mxu0 %v6328_v53  ;;  %4215 = vmatprep.subr.bf16.mxu1 %v6339_v56  ;;  %v6420_v53 = vld [vmem:[#allocation5 + $0xac4] ss:$16 sps:$4 sm:$0xff]  }
 0x15f   :  { %3887 = vmatprep.subr.bf16.mxu0 %v6336_v55 }
 0x161   :  { %4216 = vmatpush1.bf16.msra.mxu1 %v6337_v58  ;;  %v6418_v58 = vld [vmem:[#allocation5 + $0xac0] ss:$16 sps:$4 sm:$0xff]  }
 0x162   :  { %3888 = vmatpush1.bf16.msra.mxu0 %v6334_v57  ;;  %4217 = vmatprep.subr.bf16.mxu1 %v6345_v60 }
 0x163   :  { %3889 = vmatprep.subr.bf16.mxu0 %v6342_v59  ;;  %v6421_v59 = vld [vmem:[#allocation5 + $0x6c8] ss:$16 sps:$4 sm:$0xff]  }
 0x165   :  { %4218 = vmatpush1.bf16.msra.mxu1 %v6343_v62  ;;  %v6429_v62 = vld [vmem:[#allocation5 + $0x6ec] ss:$16 sps:$4 sm:$0xff]  }
 0x166   :  { %3890 = vmatpush1.bf16.msra.mxu0 %v6340_v61  ;;  %4219 = vmatprep.subr.bf16.mxu1 %v6351_v0  ;;  %v6426_v61 = vld [vmem:[#allocation5 + $0xae4] ss:$16 sps:$4 sm:$0xff]   ;;  %v6427_v0 = vld [vmem:[#allocation5 + $0x6e8] ss:$16 sps:$4 sm:$0xff]  }
 0x167   :  { %3891 = vmatprep.subr.bf16.mxu0 %v6348_v63  ;;  %v6424_v63 = vld [vmem:[#allocation5 + $0xae0] ss:$16 sps:$4 sm:$0xff]  }
 0x169   :  { %4220 = vmatpush1.bf16.msra.mxu1 %v6349_v2  ;;  %v6435_v2 = vld [vmem:[#allocation5 + $0x70c] ss:$16 sps:$4 sm:$0xff]  }
 0x16a   :  { %3892 = vmatpush1.bf16.msra.mxu0 %v6346_v1  ;;  %4221 = vmatprep.subr.bf16.mxu1 %v6357_v4  ;;  %v6432_v1 = vld [vmem:[#allocation5 + $0xb04] ss:$16 sps:$4 sm:$0xff]   ;;  %v6433_v4 = vld [vmem:[#allocation5 + $0x708] ss:$16 sps:$4 sm:$0xff]  }
 0x16b   :  { %3893 = vmatprep.subr.bf16.mxu0 %v6354_v3  ;;  %v6430_v3 = vld [vmem:[#allocation5 + $0xb00] ss:$16 sps:$4 sm:$0xff]  }
 0x16d   :  { %4222 = vmatpush1.bf16.msra.mxu1 %v6355_v6  ;;  %v6441_v6 = vld [vmem:[#allocation5 + $0x72c] ss:$16 sps:$4 sm:$0xff]  }
 0x16e   :  { %3894 = vmatpush1.bf16.msra.mxu0 %v6352_v5  ;;  %4223 = vmatprep.subr.bf16.mxu1 %v6363_v9  ;;  %v6438_v5 = vld [vmem:[#allocation5 + $0xb24] ss:$16 sps:$4 sm:$0xff]   ;;  %v6439_v9 = vld [vmem:[#allocation5 + $0x728] ss:$16 sps:$4 sm:$0xff]  }
 0x16f   :  { %3895 = vmatprep.subr.bf16.mxu0 %v6360_v7  ;;  %v6436_v7 = vld [vmem:[#allocation5 + $0xb20] ss:$16 sps:$4 sm:$0xff]  }
 0x171   :  { %4224 = vmatpush1.bf16.msra.mxu1 %v6361_v12  ;;  %v6447_v12 = vld [vmem:[#allocation5 + $0x74c] ss:$16 sps:$4 sm:$0xff]  }
 0x172   :  { %3896 = vmatpush1.bf16.msra.mxu0 %v6358_v10  ;;  %4225 = vmatprep.subr.bf16.mxu1 %v6369_v14  ;;  %v6444_v10 = vld [vmem:[#allocation5 + $0xb44] ss:$16 sps:$4 sm:$0xff]   ;;  %v6445_v14 = vld [vmem:[#allocation5 + $0x748] ss:$16 sps:$4 sm:$0xff]  }
 0x173   :  { %3897 = vmatprep.subr.bf16.mxu0 %v6366_v13  ;;  %v6442_v13 = vld [vmem:[#allocation5 + $0xb40] ss:$16 sps:$4 sm:$0xff]  }
 0x175   :  { %4226 = vmatpush1.bf16.msra.mxu1 %v6367_v17  ;;  %v6453_v17 = vld [vmem:[#allocation5 + $0x76c] ss:$16 sps:$4 sm:$0xff]  }
 0x176   :  { %3898 = vmatpush1.bf16.msra.mxu0 %v6364_v15  ;;  %4227 = vmatprep.subr.bf16.mxu1 %v6375_v19  ;;  %v6450_v15 = vld [vmem:[#allocation5 + $0xb64] ss:$16 sps:$4 sm:$0xff]   ;;  %v6451_v19 = vld [vmem:[#allocation5 + $0x768] ss:$16 sps:$4 sm:$0xff]  }
 0x177   :  { %3899 = vmatprep.subr.bf16.mxu0 %v6372_v18  ;;  %v6448_v18 = vld [vmem:[#allocation5 + $0xb60] ss:$16 sps:$4 sm:$0xff]  }
 0x179   :  { %4228 = vmatpush1.bf16.msra.mxu1 %v6373_v21  ;;  %v6459_v21 = vld [vmem:[#allocation5 + $0x78c] ss:$16 sps:$4 sm:$0xff]  }
 0x17a   :  { %3900 = vmatpush1.bf16.msra.mxu0 %v6370_v20  ;;  %4229 = vmatprep.subr.bf16.mxu1 %v6381_v24  ;;  %v6456_v20 = vld [vmem:[#allocation5 + $0xb84] ss:$16 sps:$4 sm:$0xff]   ;;  %v6457_v24 = vld [vmem:[#allocation5 + $0x788] ss:$16 sps:$4 sm:$0xff]  }
 0x17b   :  { %3901 = vmatprep.subr.bf16.mxu0 %v6378_v22  ;;  %v6454_v22 = vld [vmem:[#allocation5 + $0xb80] ss:$16 sps:$4 sm:$0xff]  }
 0x17d   :  { %4230 = vmatpush1.bf16.msra.mxu1 %v6379_v27  ;;  %v6465_v27 = vld [vmem:[#allocation5 + $0x7ac] ss:$16 sps:$4 sm:$0xff]  }
 0x17e   :  { %3902 = vmatpush1.bf16.msra.mxu0 %v6376_v26  ;;  %4240 = vmatprep.subr.bf16.mxu1 %v6387_v30  ;;  %v6462_v26 = vld [vmem:[#allocation5 + $0xba4] ss:$16 sps:$4 sm:$0xff]  }
 0x17f   :  { %3912 = vmatprep.subr.bf16.mxu0 %v6384_v29  ;;  %v6463_v29 = vld [vmem:[#allocation5 + $0x7a8] ss:$16 sps:$4 sm:$0xff]   ;;  %v6468_v30 = vld [vmem:[#allocation5 + $0xbc4] ss:$16 sps:$4 sm:$0xff]  }
 0x180   :  { %4232 = vmatmul.mubr.bf16.vlgmr.msra.gmra.mrb[4].mxu1 %v7333_v16  ;;  %v6405_v16 = vld [vmem:[#allocation5 + $0x66c] ss:$16 sps:$4 sm:$0xff]  }
 0x181   :  { %3904 = vmatmul.mubr.bf16.vlgmr.msra.gmra.mrb[0].mxu0 %v7349_v32  ;;  %4241 = vmatpush1.bf16.msra.mxu1 %v6385_v34  ;;  %v6469_v34 = vld [vmem:[#allocation5 + $0x7c8] ss:$16 sps:$4 sm:$0xff]  }
 0x182   :  { %3913 = vmatpush1.bf16.msra.mxu0 %v6382_v31  ;;  %4242 = vmatprep.subr.bf16.mxu1 %v6393_v52  ;;  %v6471_v31 = vld [vmem:[#allocation5 + $0x7cc] ss:$16 sps:$4 sm:$0xff]  }
 0x183   :  { %3914 = vmatprep.subr.bf16.mxu0 %v6390_v35  ;;  %3944 = vmatprep.mubr.bf16.mxu0 %v7351_v11  ;;  %v6474_v35 = vld [vmem:[#allocation5 + $0xbe4] ss:$16 sps:$4 sm:$0xff]   ;;  %v6477_v52 = vld [vmem:[#allocation5 + $0x7ec] ss:$16 sps:$4 sm:$0xff]  }
 0x184   :  { %4272 = vmatprep.mubr.bf16.mxu1 %v7337_v23  ;;  %v6409_v23 = vld [vmem:[#allocation5 + $0x688] ss:$16 sps:$4 sm:$0xff]  }
 0x185   :  { %4243 = vmatpush1.bf16.msra.mxu1 %v6391_v38  ;;  %v6475_v38 = vld [vmem:[#allocation5 + $0x7e8] ss:$16 sps:$4 sm:$0xff]  }
 0x186   :  { %3915 = vmatpush1.bf16.msra.mxu0 %v6388_v37  ;;  %4244 = vmatprep.subr.bf16.mxu1 %v6399_v40  ;;  %v6472_v37 = vld [vmem:[#allocation5 + $0xbe0] ss:$16 sps:$4 sm:$0xff]   ;;  %v125_v40 = vld [vmem:[#allocation2 + $0x50] sm:$0xff] }
 0x187   :  { %3916 = vmatprep.subr.bf16.mxu0 %v6396_v39  ;;  %v6480_v39 = vld [vmem:[#allocation5 + $0xc04] ss:$16 sps:$4 sm:$0xff]  }
 0x189   :  { %4245 = vmatpush1.bf16.msra.mxu1 %v6397_v36  ;;  %v128_v36 = vld [vmem:[#allocation2 + $0x68] sm:$0xff] }
 0x18a   :  { %3917 = vmatpush1.bf16.msra.mxu0 %v6394_v41  ;;  %4246 = vmatprep.subr.bf16.mxu1 %v6405_v16  ;;  %v6483_v41 = vld [vmem:[#allocation5 + $0x80c] ss:$16 sps:$4 sm:$0xff]   ;;  %v6478_v16 = vld [vmem:[#allocation5 + $0xc00] ss:$16 sps:$4 sm:$0xff]  }
 0x18b   :  { %3918 = vmatprep.subr.bf16.mxu0 %v6402_v42  ;;  %v7361_v42 = vpack.c.bf16 %v125_v40, %v125_v40  ;;  %v6567_v40 = vld [vmem:[#allocation5 + $0x9cc] ss:$16 sps:$4 sm:$0xff]  }
 0x18d   :  { %4247 = vmatpush1.bf16.msra.mxu1 %v6403_v44  ;;  %v6486_v44 = vld [vmem:[#allocation5 + $0xc24] ss:$16 sps:$4 sm:$0xff]  }
 0x18e   :  { %3919 = vmatpush1.bf16.msra.mxu0 %v6400_v43  ;;  %4248 = vmatprep.subr.bf16.mxu1 %v6411_v46  ;;  %v6481_v43 = vld [vmem:[#allocation5 + $0x808] ss:$16 sps:$4 sm:$0xff]   ;;  %v7363_v46 = vpack.c.bf16 %v128_v36, %v128_v36 }
 0x18f   :  { %3920 = vmatprep.subr.bf16.mxu0 %v6408_v45  ;;  %v6489_v45 = vld [vmem:[#allocation5 + $0x82c] ss:$16 sps:$4 sm:$0xff]   ;;  %v6565_v36 = vld [vmem:[#allocation5 + $0x9c8] ss:$16 sps:$4 sm:$0xff]  }
 0x191   :  { %4249 = vmatpush1.bf16.msra.mxu1 %v6409_v23  ;;  %v6487_v23 = vld [vmem:[#allocation5 + $0x828] ss:$16 sps:$4 sm:$0xff]  }
 0x192   :  { %3921 = vmatpush1.bf16.msra.mxu0 %v6406_v47  ;;  %4250 = vmatprep.subr.bf16.mxu1 %v6417_v49  ;;  %v6484_v47 = vld [vmem:[#allocation5 + $0xc20] ss:$16 sps:$4 sm:$0xff]   ;;  %v6495_v49 = vld [vmem:[#allocation5 + $0x84c] ss:$16 sps:$4 sm:$0xff]  }
 0x193   :  { %3922 = vmatprep.subr.bf16.mxu0 %v6414_v48  ;;  %v7357_v55 = vpop.f32.mrb[0].mxu1  ;;  %v6492_v48 = vld [vmem:[#allocation5 + $0xc44] ss:$16 sps:$4 sm:$0xff]  }
 0x194   :  { %v7359_v56 = vpop.f32.mrb[1].mxu1 }
 0x195   :  { %v3745_v57 = vpop.f32.mrb[2].mxu1  ;;  %4251 = vmatpush1.bf16.msra.mxu1 %v6415_v51  ;;  %v6493_v51 = vld [vmem:[#allocation5 + $0x848] ss:$16 sps:$4 sm:$0xff]  }
 0x196   :  { %3923 = vmatpush1.bf16.msra.mxu0 %v6412_v50  ;;  %v3746_v60 = vpop.f32.mrb[3].mxu1  ;;  %4252 = vmatprep.subr.bf16.mxu1 %v6423_v54  ;;  %v6490_v50 = vld [vmem:[#allocation5 + $0xc40] ss:$16 sps:$4 sm:$0xff]   ;;  %v6499_v57 = vld [vmem:[#allocation5 + $0x868] ss:$16 sps:$4 sm:$0xff]  }
 0x197   :  { %3924 = vmatprep.subr.bf16.mxu0 %v6420_v53  ;;  %v6498_v53 = vld [vmem:[#allocation5 + $0xc64] ss:$16 sps:$4 sm:$0xff]   ;;  %v6496_v54 = vld [vmem:[#allocation5 + $0xc60] ss:$16 sps:$4 sm:$0xff]  }
 0x198   :  { %v6502_v60 = vld [vmem:[#allocation5 + $0xc80] ss:$16 sps:$4 sm:$0xff]  }
 0x199   :  { %4253 = vmatpush1.bf16.msra.mxu1 %v6421_v59  ;;  %v6507_v59 = vld [vmem:[#allocation5 + $0x88c] ss:$16 sps:$4 sm:$0xff]  }
 0x19a   :  { %3925 = vmatpush1.bf16.msra.mxu0 %v6418_v58  ;;  %4254 = vmatprep.subr.bf16.mxu1 %v6429_v62  ;;  %v6504_v58 = vld [vmem:[#allocation5 + $0xc84] ss:$16 sps:$4 sm:$0xff]   ;;  %v6513_v62 = vld [vmem:[#allocation5 + $0x8ac] ss:$16 sps:$4 sm:$0xff]  }
 0x19b   :  { %3926 = vmatprep.subr.bf16.mxu0 %v6426_v61  ;;  %v6510_v61 = vld [vmem:[#allocation5 + $0xca4] ss:$16 sps:$4 sm:$0xff]  }
 0x19d   :  { %4255 = vmatpush1.bf16.msra.mxu1 %v6427_v0  ;;  %v6511_v0 = vld [vmem:[#allocation5 + $0x8a8] ss:$16 sps:$4 sm:$0xff]  }
 0x19e   :  { %3927 = vmatpush1.bf16.msra.mxu0 %v6424_v63  ;;  %4256 = vmatprep.subr.bf16.mxu1 %v6435_v2  ;;  %v6508_v63 = vld [vmem:[#allocation5 + $0xca0] ss:$16 sps:$4 sm:$0xff]   ;;  %v6519_v2 = vld [vmem:[#allocation5 + $0x8cc] ss:$16 sps:$4 sm:$0xff]  }
 0x19f   :  { %3928 = vmatprep.subr.bf16.mxu0 %v6432_v1  ;;  %v6516_v1 = vld [vmem:[#allocation5 + $0xcc4] ss:$16 sps:$4 sm:$0xff]  }
 0x1a1   :  { %4257 = vmatpush1.bf16.msra.mxu1 %v6433_v4  ;;  %v6517_v4 = vld [vmem:[#allocation5 + $0x8c8] ss:$16 sps:$4 sm:$0xff]  }
 0x1a2   :  { %3929 = vmatpush1.bf16.msra.mxu0 %v6430_v3  ;;  %4258 = vmatprep.subr.bf16.mxu1 %v6441_v6  ;;  %v6514_v3 = vld [vmem:[#allocation5 + $0xcc0] ss:$16 sps:$4 sm:$0xff]   ;;  %v6525_v6 = vld [vmem:[#allocation5 + $0x8ec] ss:$16 sps:$4 sm:$0xff]  }
 0x1a3   :  { %3930 = vmatprep.subr.bf16.mxu0 %v6438_v5  ;;  %v6522_v5 = vld [vmem:[#allocation5 + $0xce4] ss:$16 sps:$4 sm:$0xff]  }
 0x1a5   :  { %4259 = vmatpush1.bf16.msra.mxu1 %v6439_v9  ;;  %v6523_v9 = vld [vmem:[#allocation5 + $0x8e8] ss:$16 sps:$4 sm:$0xff]  }
 0x1a6   :  { %3931 = vmatpush1.bf16.msra.mxu0 %v6436_v7  ;;  %4260 = vmatprep.subr.bf16.mxu1 %v6447_v12  ;;  %v6520_v7 = vld [vmem:[#allocation5 + $0xce0] ss:$16 sps:$4 sm:$0xff]   ;;  %v6531_v12 = vld [vmem:[#allocation5 + $0x90c] ss:$16 sps:$4 sm:$0xff]  }
 0x1a7   :  { %3932 = vmatprep.subr.bf16.mxu0 %v6444_v10  ;;  %v6528_v10 = vld [vmem:[#allocation5 + $0xd04] ss:$16 sps:$4 sm:$0xff]  }
 0x1a9   :  { %4261 = vmatpush1.bf16.msra.mxu1 %v6445_v14  ;;  %v6529_v14 = vld [vmem:[#allocation5 + $0x908] ss:$16 sps:$4 sm:$0xff]  }
 0x1aa   :  { %3933 = vmatpush1.bf16.msra.mxu0 %v6442_v13  ;;  %4262 = vmatprep.subr.bf16.mxu1 %v6453_v17  ;;  %v6526_v13 = vld [vmem:[#allocation5 + $0xd00] ss:$16 sps:$4 sm:$0xff]   ;;  %v6537_v17 = vld [vmem:[#allocation5 + $0x92c] ss:$16 sps:$4 sm:$0xff]  }
 0x1ab   :  { %3934 = vmatprep.subr.bf16.mxu0 %v6450_v15  ;;  %v6534_v15 = vld [vmem:[#allocation5 + $0xd24] ss:$16 sps:$4 sm:$0xff]  }
 0x1ad   :  { %4263 = vmatpush1.bf16.msra.mxu1 %v6451_v19  ;;  %v6535_v19 = vld [vmem:[#allocation5 + $0x928] ss:$16 sps:$4 sm:$0xff]  }
 0x1ae   :  { %3935 = vmatpush1.bf16.msra.mxu0 %v6448_v18  ;;  %4264 = vmatprep.subr.bf16.mxu1 %v6459_v21  ;;  %v6532_v18 = vld [vmem:[#allocation5 + $0xd20] ss:$16 sps:$4 sm:$0xff]   ;;  %v6543_v21 = vld [vmem:[#allocation5 + $0x94c] ss:$16 sps:$4 sm:$0xff]  }
 0x1af   :  { %3936 = vmatprep.subr.bf16.mxu0 %v6456_v20  ;;  %v6540_v20 = vld [vmem:[#allocation5 + $0xd44] ss:$16 sps:$4 sm:$0xff]  }
 0x1b1   :  { %4265 = vmatpush1.bf16.msra.mxu1 %v6457_v24  ;;  %v6541_v24 = vld [vmem:[#allocation5 + $0x948] ss:$16 sps:$4 sm:$0xff]  }
 0x1b2   :  { %3937 = vmatpush1.bf16.msra.mxu0 %v6454_v22  ;;  %4266 = vmatprep.subr.bf16.mxu1 %v6465_v27  ;;  %v6538_v22 = vld [vmem:[#allocation5 + $0xd40] ss:$16 sps:$4 sm:$0xff]   ;;  %v6549_v27 = vld [vmem:[#allocation5 + $0x96c] ss:$16 sps:$4 sm:$0xff]  }
 0x1b3   :  { %3938 = vmatprep.subr.bf16.mxu0 %v6462_v26  ;;  %v6546_v26 = vld [vmem:[#allocation5 + $0xd64] ss:$16 sps:$4 sm:$0xff]  }
 0x1b5   :  { %4267 = vmatpush1.bf16.msra.mxu1 %v6463_v29  ;;  %v6547_v29 = vld [vmem:[#allocation5 + $0x968] ss:$16 sps:$4 sm:$0xff]  }
 0x1b6   :  { %3939 = vmatpush1.bf16.msra.mxu0 %v6460_v28  ;;  %4268 = vmatprep.subr.bf16.mxu1 %v6471_v31  ;;  %v6544_v28 = vld [vmem:[#allocation5 + $0xd60] ss:$16 sps:$4 sm:$0xff]   ;;  %v6555_v31 = vld [vmem:[#allocation5 + $0x98c] ss:$16 sps:$4 sm:$0xff]  }
 0x1b7   :  { %3940 = vmatprep.subr.bf16.mxu0 %v6468_v30  ;;  %v6552_v30 = vld [vmem:[#allocation5 + $0xd84] ss:$16 sps:$4 sm:$0xff]  }
 0x1b9   :  { %4269 = vmatpush1.bf16.msra.mxu1 %v6469_v34  ;;  %v6553_v34 = vld [vmem:[#allocation5 + $0x988] ss:$16 sps:$4 sm:$0xff]  }
 0x1ba   :  { %3941 = vmatpush1.bf16.msra.mxu0 %v6466_v33  ;;  %4270 = vmatprep.subr.bf16.mxu1 %v6477_v52  ;;  %v6550_v33 = vld [vmem:[#allocation5 + $0xd80] ss:$16 sps:$4 sm:$0xff]   ;;  %v6561_v52 = vld [vmem:[#allocation5 + $0x9ac] ss:$16 sps:$4 sm:$0xff]  }
 0x1bb   :  { %3942 = vmatprep.subr.bf16.mxu0 %v6474_v35  ;;  %v6558_v35 = vld [vmem:[#allocation5 + $0xda4] ss:$16 sps:$4 sm:$0xff]  }
 0x1bd   :  { %4271 = vmatpush1.bf16.msra.mxu1 %v6475_v38  ;;  %v6559_v38 = vld [vmem:[#allocation5 + $0x9a8] ss:$16 sps:$4 sm:$0xff]  }
 0x1be   :  { %3943 = vmatpush1.bf16.msra.mxu0 %v6472_v37  ;;  %4281 = vmatprep.subr.bf16.mxu1 %v6483_v41  ;;  %v6556_v37 = vld [vmem:[#allocation5 + $0xda0] ss:$16 sps:$4 sm:$0xff]  }
 0x1bf   :  { %3953 = vmatprep.subr.bf16.mxu0 %v6480_v39  ;;  %v6564_v39 = vld [vmem:[#allocation5 + $0xdc4] ss:$16 sps:$4 sm:$0xff]   ;;  %v6562_v41 = vld [vmem:[#allocation5 + $0xdc0] ss:$16 sps:$4 sm:$0xff]  }
 0x1c0   :  { %4273 = vmatmul.mubr.bf16.vlgmr.msra.gmra.mrb[4].mxu1 %v7341_v25  ;;  %v6501_v25 = vld [vmem:[#allocation5 + $0x86c] ss:$16 sps:$4 sm:$0xff]  }
 0x1c1   :  { %3945 = vmatmul.mubr.bf16.vlgmr.msra.gmra.mrb[0].mxu0 %v7361_v42  ;;  %4282 = vmatpush1.bf16.msra.mxu1 %v6481_v43  ;;  %v6573_v43 = vld [vmem:[#allocation5 + $0x9ec] ss:$16 sps:$4 sm:$0xff]  }
 0x1c2   :  { %3954 = vmatpush1.bf16.msra.mxu0 %v6478_v16  ;;  %4283 = vmatprep.subr.bf16.mxu1 %v6489_v45  ;;  %v6570_v16 = vld [vmem:[#allocation5 + $0xde4] ss:$16 sps:$4 sm:$0xff]   ;;  %v6571_v45 = vld [vmem:[#allocation5 + $0x9e8] ss:$16 sps:$4 sm:$0xff]  }
 0x1c3   :  { %3955 = vmatprep.subr.bf16.mxu0 %v6486_v44  ;;  %3985 = vmatprep.mubr.bf16.mxu0 %v7363_v46  ;;  %v6568_v44 = vld [vmem:[#allocation5 + $0xde0] ss:$16 sps:$4 sm:$0xff]  }
 0x1c4   :  { %4313 = vmatprep.mubr.bf16.mxu1 %v7343_v8  ;;  %v6505_v8 = vld [vmem:[#allocation5 + $0x888] ss:$16 sps:$4 sm:$0xff]  }
 0x1c5   :  { %4284 = vmatpush1.bf16.msra.mxu1 %v6487_v23  ;;  %v6576_v23 = vld [vmem:[#allocation5 + $0xe04] ss:$16 sps:$4 sm:$0xff]  }
 0x1c6   :  { %3956 = vmatpush1.bf16.msra.mxu0 %v6484_v47  ;;  %4285 = vmatprep.subr.bf16.mxu1 %v6495_v49  ;;  %v127_v47 = vld [vmem:[#allocation2 + $0x60] sm:$0xff]  ;;  %v6574_v49 = vld [vmem:[#allocation5 + $0xe00] ss:$16 sps:$4 sm:$0xff]  }
 0x1c7   :  { %3957 = vmatprep.subr.bf16.mxu0 %v6492_v48  ;;  %v6579_v48 = vld [vmem:[#allocation5 + $0xa0c] ss:$16 sps:$4 sm:$0xff]  }
 0x1c9   :  { %4286 = vmatpush1.bf16.msra.mxu1 %v6493_v51  ;;  %v130_v51 = vld [vmem:[#allocation2 + $0x78] sm:$0xff] }
 0x1ca   :  { %3958 = vmatpush1.bf16.msra.mxu0 %v6490_v50  ;;  %4287 = vmatprep.subr.bf16.mxu1 %v6501_v25  ;;  %v7369_v50 = vpack.c.bf16 %v127_v47, %v127_v47  ;;  %v6582_v25 = vld [vmem:[#allocation5 + $0xe24] ss:$16 sps:$4 sm:$0xff]  }
 0x1cb   :  { %3959 = vmatprep.subr.bf16.mxu0 %v6498_v53  ;;  %v6577_v53 = vld [vmem:[#allocation5 + $0xa08] ss:$16 sps:$4 sm:$0xff]   ;;  %v6660_v47 = vld [vmem:[#allocation5 + $0xfc4] ss:$16 sps:$4 sm:$0xff]  }
 0x1cd   :  { %4288 = vmatpush1.bf16.msra.mxu1 %v6499_v57  ;;  %v7371_v57 = vpack.c.bf16 %v130_v51, %v130_v51  ;;  %v6666_v51 = vld [vmem:[#allocation5 + $0xfe4] ss:$16 sps:$4 sm:$0xff]  }
 0x1ce   :  { %3960 = vmatpush1.bf16.msra.mxu0 %v6496_v54  ;;  %4289 = vmatprep.subr.bf16.mxu1 %v6507_v59  ;;  %v6585_v54 = vld [vmem:[#allocation5 + $0xa2c] ss:$16 sps:$4 sm:$0xff]   ;;  %v6583_v59 = vld [vmem:[#allocation5 + $0xa28] ss:$16 sps:$4 sm:$0xff]  }
 0x1cf   :  { %3961 = vmatprep.subr.bf16.mxu0 %v6504_v58  ;;  %v6580_v58 = vld [vmem:[#allocation5 + $0xe20] ss:$16 sps:$4 sm:$0xff]  }
 0x1d1   :  { %4290 = vmatpush1.bf16.msra.mxu1 %v6505_v8  ;;  %v6591_v8 = vld [vmem:[#allocation5 + $0xa4c] ss:$16 sps:$4 sm:$0xff]  }
 0x1d2   :  { %3962 = vmatpush1.bf16.msra.mxu0 %v6502_v60  ;;  %4291 = vmatprep.subr.bf16.mxu1 %v6513_v62  ;;  %v6588_v60 = vld [vmem:[#allocation5 + $0xe44] ss:$16 sps:$4 sm:$0xff]   ;;  %v6589_v62 = vld [vmem:[#allocation5 + $0xa48] ss:$16 sps:$4 sm:$0xff]  }
 0x1d3   :  { %3963 = vmatprep.subr.bf16.mxu0 %v6510_v61  ;;  %v6586_v61 = vld [vmem:[#allocation5 + $0xe40] ss:$16 sps:$4 sm:$0xff]  }
 0x1d5   :  { %4292 = vmatpush1.bf16.msra.mxu1 %v6511_v0  ;;  %v6592_v0 = vld [vmem:[#allocation5 + $0xe60] ss:$16 sps:$4 sm:$0xff]  }
 0x1d6   :  { %3964 = vmatpush1.bf16.msra.mxu0 %v6508_v63  ;;  %4293 = vmatprep.subr.bf16.mxu1 %v6519_v2  ;;  %v6594_v63 = vld [vmem:[#allocation5 + $0xe64] ss:$16 sps:$4 sm:$0xff]  }
 0x1d7   :  { %3965 = vmatprep.subr.bf16.mxu0 %v6516_v1  ;;  %v6595_v1 = vld [vmem:[#allocation5 + $0xa68] ss:$16 sps:$4 sm:$0xff]   ;;  %v6600_v2 = vld [vmem:[#allocation5 + $0xe84] ss:$16 sps:$4 sm:$0xff]  }
 0x1d9   :  { %4294 = vmatpush1.bf16.msra.mxu1 %v6517_v4  ;;  %v6598_v4 = vld [vmem:[#allocation5 + $0xe80] ss:$16 sps:$4 sm:$0xff]  }
 0x1da   :  { %3966 = vmatpush1.bf16.msra.mxu0 %v6514_v3  ;;  %4295 = vmatprep.subr.bf16.mxu1 %v6525_v6  ;;  %v6603_v3 = vld [vmem:[#allocation5 + $0xa8c] ss:$16 sps:$4 sm:$0xff]  }
 0x1db   :  { %3967 = vmatprep.subr.bf16.mxu0 %v6522_v5  ;;  %v6601_v5 = vld [vmem:[#allocation5 + $0xa88] ss:$16 sps:$4 sm:$0xff]   ;;  %v6609_v6 = vld [vmem:[#allocation5 + $0xaac] ss:$16 sps:$4 sm:$0xff]  }
 0x1dd   :  { %4296 = vmatpush1.bf16.msra.mxu1 %v6523_v9  ;;  %v6607_v9 = vld [vmem:[#allocation5 + $0xaa8] ss:$16 sps:$4 sm:$0xff]  }
 0x1de   :  { %3968 = vmatpush1.bf16.msra.mxu0 %v6520_v7  ;;  %4297 = vmatprep.subr.bf16.mxu1 %v6531_v12  ;;  %v6604_v7 = vld [vmem:[#allocation5 + $0xea0] ss:$16 sps:$4 sm:$0xff]   ;;  %v6615_v12 = vld [vmem:[#allocation5 + $0xacc] ss:$16 sps:$4 sm:$0xff]  }
 0x1df   :  { %3969 = vmatprep.subr.bf16.mxu0 %v6528_v10  ;;  %v6612_v10 = vld [vmem:[#allocation5 + $0xec4] ss:$16 sps:$4 sm:$0xff]  }
 0x1e1   :  { %4298 = vmatpush1.bf16.msra.mxu1 %v6529_v14  ;;  %v6613_v14 = vld [vmem:[#allocation5 + $0xac8] ss:$16 sps:$4 sm:$0xff]  }
 0x1e2   :  { %3970 = vmatpush1.bf16.msra.mxu0 %v6526_v13  ;;  %4299 = vmatprep.subr.bf16.mxu1 %v6537_v17  ;;  %v6610_v13 = vld [vmem:[#allocation5 + $0xec0] ss:$16 sps:$4 sm:$0xff]   ;;  %v6621_v17 = vld [vmem:[#allocation5 + $0xaec] ss:$16 sps:$4 sm:$0xff]  }
 0x1e3   :  { %3971 = vmatprep.subr.bf16.mxu0 %v6534_v15  ;;  %v6618_v15 = vld [vmem:[#allocation5 + $0xee4] ss:$16 sps:$4 sm:$0xff]  }
 0x1e5   :  { %4300 = vmatpush1.bf16.msra.mxu1 %v6535_v19  ;;  %v6619_v19 = vld [vmem:[#allocation5 + $0xae8] ss:$16 sps:$4 sm:$0xff]  }
 0x1e6   :  { %3972 = vmatpush1.bf16.msra.mxu0 %v6532_v18  ;;  %4301 = vmatprep.subr.bf16.mxu1 %v6543_v21  ;;  %v6616_v18 = vld [vmem:[#allocation5 + $0xee0] ss:$16 sps:$4 sm:$0xff]   ;;  %v6627_v21 = vld [vmem:[#allocation5 + $0xb0c] ss:$16 sps:$4 sm:$0xff]  }
 0x1e7   :  { %3973 = vmatprep.subr.bf16.mxu0 %v6540_v20  ;;  %v6624_v20 = vld [vmem:[#allocation5 + $0xf04] ss:$16 sps:$4 sm:$0xff]  }
 0x1e9   :  { %4302 = vmatpush1.bf16.msra.mxu1 %v6541_v24  ;;  %v6625_v24 = vld [vmem:[#allocation5 + $0xb08] ss:$16 sps:$4 sm:$0xff]  }
 0x1ea   :  { %3974 = vmatpush1.bf16.msra.mxu0 %v6538_v22  ;;  %4303 = vmatprep.subr.bf16.mxu1 %v6549_v27  ;;  %v6622_v22 = vld [vmem:[#allocation5 + $0xf00] ss:$16 sps:$4 sm:$0xff]   ;;  %v6633_v27 = vld [vmem:[#allocation5 + $0xb2c] ss:$16 sps:$4 sm:$0xff]  }
 0x1eb   :  { %3975 = vmatprep.subr.bf16.mxu0 %v6546_v26  ;;  %v6630_v26 = vld [vmem:[#allocation5 + $0xf24] ss:$16 sps:$4 sm:$0xff]  }
 0x1ed   :  { %4304 = vmatpush1.bf16.msra.mxu1 %v6547_v29  ;;  %v6631_v29 = vld [vmem:[#allocation5 + $0xb28] ss:$16 sps:$4 sm:$0xff]  }
 0x1ee   :  { %3976 = vmatpush1.bf16.msra.mxu0 %v6544_v28  ;;  %4305 = vmatprep.subr.bf16.mxu1 %v6555_v31  ;;  %v6628_v28 = vld [vmem:[#allocation5 + $0xf20] ss:$16 sps:$4 sm:$0xff]   ;;  %v6639_v31 = vld [vmem:[#allocation5 + $0xb4c] ss:$16 sps:$4 sm:$0xff]  }
 0x1ef   :  { %3977 = vmatprep.subr.bf16.mxu0 %v6552_v30  ;;  %v6636_v30 = vld [vmem:[#allocation5 + $0xf44] ss:$16 sps:$4 sm:$0xff]  }
 0x1f1   :  { %4306 = vmatpush1.bf16.msra.mxu1 %v6553_v34  ;;  %v6637_v34 = vld [vmem:[#allocation5 + $0xb48] ss:$16 sps:$4 sm:$0xff]  }
 0x1f2   :  { %3978 = vmatpush1.bf16.msra.mxu0 %v6550_v33  ;;  %4307 = vmatprep.subr.bf16.mxu1 %v6561_v52  ;;  %v6634_v33 = vld [vmem:[#allocation5 + $0xf40] ss:$16 sps:$4 sm:$0xff]   ;;  %v6645_v52 = vld [vmem:[#allocation5 + $0xb6c] ss:$16 sps:$4 sm:$0xff]  }
 0x1f3   :  { %3979 = vmatprep.subr.bf16.mxu0 %v6558_v35  ;;  %v6642_v35 = vld [vmem:[#allocation5 + $0xf64] ss:$16 sps:$4 sm:$0xff]  }
 0x1f5   :  { %4308 = vmatpush1.bf16.msra.mxu1 %v6559_v38  ;;  %v6643_v38 = vld [vmem:[#allocation5 + $0xb68] ss:$16 sps:$4 sm:$0xff]  }
 0x1f6   :  { %3980 = vmatpush1.bf16.msra.mxu0 %v6556_v37  ;;  %4309 = vmatprep.subr.bf16.mxu1 %v6567_v40  ;;  %v6640_v37 = vld [vmem:[#allocation5 + $0xf60] ss:$16 sps:$4 sm:$0xff]   ;;  %v6651_v40 = vld [vmem:[#allocation5 + $0xb8c] ss:$16 sps:$4 sm:$0xff]  }
 0x1f7   :  { %3981 = vmatprep.subr.bf16.mxu0 %v6564_v39  ;;  %v6648_v39 = vld [vmem:[#allocation5 + $0xf84] ss:$16 sps:$4 sm:$0xff]  }
 0x1f9   :  { %4310 = vmatpush1.bf16.msra.mxu1 %v6565_v36  ;;  %v6649_v36 = vld [vmem:[#allocation5 + $0xb88] ss:$16 sps:$4 sm:$0xff]  }
 0x1fa   :  { %3982 = vmatpush1.bf16.msra.mxu0 %v6562_v41  ;;  %4311 = vmatprep.subr.bf16.mxu1 %v6573_v43  ;;  %v6646_v41 = vld [vmem:[#allocation5 + $0xf80] ss:$16 sps:$4 sm:$0xff]   ;;  %v6657_v43 = vld [vmem:[#allocation5 + $0xbac] ss:$16 sps:$4 sm:$0xff]  }
 0x1fb   :  { %3983 = vmatprep.subr.bf16.mxu0 %v6570_v16  ;;  %v6654_v16 = vld [vmem:[#allocation5 + $0xfa4] ss:$16 sps:$4 sm:$0xff]  }
 0x1fd   :  { %4312 = vmatpush1.bf16.msra.mxu1 %v6571_v45  ;;  %v6655_v45 = vld [vmem:[#allocation5 + $0xba8] ss:$16 sps:$4 sm:$0xff]  }
 0x1fe   :  { %3984 = vmatpush1.bf16.msra.mxu0 %v6568_v44  ;;  %4322 = vmatprep.subr.bf16.mxu1 %v6579_v48  ;;  %v6652_v44 = vld [vmem:[#allocation5 + $0xfa0] ss:$16 sps:$4 sm:$0xff]  }
 0x1ff   :  { %3994 = vmatprep.subr.bf16.mxu0 %v6576_v23  ;;  %v6663_v23 = vld [vmem:[#allocation5 + $0xbcc] ss:$16 sps:$4 sm:$0xff]   ;;  %v6658_v48 = vld [vmem:[#allocation5 + $0xfc0] ss:$16 sps:$4 sm:$0xff]  }
 0x200   :  { %4314 = vmatmul.mubr.bf16.vlgmr.msra.gmra.mrb[4].mxu1 %v7349_v32  ;;  %v6597_v32 = vld [vmem:[#allocation5 + $0xa6c] ss:$16 sps:$4 sm:$0xff]  }
 0x201   :  { %3986 = vmatmul.mubr.bf16.vlgmr.msra.gmra.mrb[0].mxu0 %v7369_v50  ;;  %4323 = vmatpush1.bf16.msra.mxu1 %v6577_v53  ;;  %v6669_v53 = vld [vmem:[#allocation5 + $0xbec] ss:$16 sps:$4 sm:$0xff]  }
 0x202   :  { %3995 = vmatpush1.bf16.msra.mxu0 %v6574_v49  ;;  %4324 = vmatprep.subr.bf16.mxu1 %v6585_v54  ;;  %v6661_v49 = vld [vmem:[#allocation5 + $0xbc8] ss:$16 sps:$4 sm:$0xff]  }
 0x203   :  { %3996 = vmatprep.subr.bf16.mxu0 %v6582_v25  ;;  %4026 = vmatprep.mubr.bf16.mxu0 %v7371_v57  ;;  %v6664_v25 = vld [vmem:[#allocation5 + $0xfe0] ss:$16 sps:$4 sm:$0xff]   ;;  %v6667_v54 = vld [vmem:[#allocation5 + $0xbe8] ss:$16 sps:$4 sm:$0xff]  }
 0x204   :  { %4354 = vmatprep.mubr.bf16.mxu1 %v7351_v11  ;;  %v6606_v11 = vld [vmem:[#allocation5 + $0xea4] ss:$16 sps:$4 sm:$0xff]  }
 0x205   :  { %4325 = vmatpush1.bf16.msra.mxu1 %v6583_v59  ;;  %v6672_v59 = vld [vmem:[#allocation5 + $0x1004] ss:$16 sps:$4 sm:$0xff]  }
 0x206   :  { %3997 = vmatpush1.bf16.msra.mxu0 %v6580_v58  ;;  %4326 = vmatprep.subr.bf16.mxu1 %v6591_v8  ;;  %v129_v58 = vld [vmem:[#allocation2 + $0x70] sm:$0xff] }
 0x207   :  { %3998 = vmatprep.subr.bf16.mxu0 %v6588_v60  ;;  %v6675_v60 = vld [vmem:[#allocation5 + $0xc0c] ss:$16 sps:$4 sm:$0xff]   ;;  %v7377_v8 = vpack.c.bf16 %v129_v58, %v129_v58  ;;  %v6756_v58 = vld [vmem:[#allocation5 + $0x11c4] ss:$16 sps:$4 sm:$0xff]  }
 0x209   :  { %4327 = vmatpush1.bf16.msra.mxu1 %v6589_v62  ;;  %v6670_v62 = vld [vmem:[#allocation5 + $0x1000] ss:$16 sps:$4 sm:$0xff]  }
 0x20a   :  { %3999 = vmatpush1.bf16.msra.mxu0 %v6586_v61  ;;  %4328 = vmatprep.subr.bf16.mxu1 %v6597_v32  ;;  %v132_v61 = vld [vmem:[#allocation2 + $0x88] sm:$0xff] }
 0x20b   :  { %4000 = vmatprep.subr.bf16.mxu0 %v6594_v63  ;;  %v6673_v63 = vld [vmem:[#allocation5 + $0xc08] ss:$16 sps:$4 sm:$0xff]   ;;  %v6678_v32 = vld [vmem:[#allocation5 + $0x1024] ss:$16 sps:$4 sm:$0xff]  }
 0x20d   :  { %4329 = vmatpush1.bf16.msra.mxu1 %v6595_v1  ;;  %v7379_v1 = vpack.c.bf16 %v132_v61, %v132_v61  ;;  %v6757_v61 = vld [vmem:[#allocation5 + $0xdc8] ss:$16 sps:$4 sm:$0xff]  }
 0x20e   :  { %4001 = vmatpush1.bf16.msra.mxu0 %v6592_v0  ;;  %4330 = vmatprep.subr.bf16.mxu1 %v6603_v3  ;;  %v6681_v0 = vld [vmem:[#allocation5 + $0xc2c] ss:$16 sps:$4 sm:$0xff]   ;;  %v6679_v3 = vld [vmem:[#allocation5 + $0xc28] ss:$16 sps:$4 sm:$0xff]  }
 0x20f   :  { %4002 = vmatprep.subr.bf16.mxu0 %v6600_v2  ;;  %v6676_v2 = vld [vmem:[#allocation5 + $0x1020] ss:$16 sps:$4 sm:$0xff]  }
 0x211   :  { %4331 = vmatpush1.bf16.msra.mxu1 %v6601_v5  ;;  %v6687_v5 = vld [vmem:[#allocation5 + $0xc4c] ss:$16 sps:$4 sm:$0xff]  }
 0x212   :  { %4003 = vmatpush1.bf16.msra.mxu0 %v6598_v4  ;;  %4332 = vmatprep.subr.bf16.mxu1 %v6609_v6  ;;  %v6684_v4 = vld [vmem:[#allocation5 + $0x1044] ss:$16 sps:$4 sm:$0xff]   ;;  %v6685_v6 = vld [vmem:[#allocation5 + $0xc48] ss:$16 sps:$4 sm:$0xff]  }
 0x213   :  { %4004 = vmatprep.subr.bf16.mxu0 %v6606_v11  ;;  %v6682_v11 = vld [vmem:[#allocation5 + $0x1040] ss:$16 sps:$4 sm:$0xff]  }
 0x215   :  { %4333 = vmatpush1.bf16.msra.mxu1 %v6607_v9  ;;  %v6688_v9 = vld [vmem:[#allocation5 + $0x1060] ss:$16 sps:$4 sm:$0xff]  }
 0x216   :  { %4005 = vmatpush1.bf16.msra.mxu0 %v6604_v7  ;;  %4334 = vmatprep.subr.bf16.mxu1 %v6615_v12  ;;  %v6690_v7 = vld [vmem:[#allocation5 + $0x1064] ss:$16 sps:$4 sm:$0xff]  }
 0x217   :  { %4006 = vmatprep.subr.bf16.mxu0 %v6612_v10  ;;  %v6691_v10 = vld [vmem:[#allocation5 + $0xc68] ss:$16 sps:$4 sm:$0xff]   ;;  %v6696_v12 = vld [vmem:[#allocation5 + $0x1084] ss:$16 sps:$4 sm:$0xff]  }
 0x219   :  { %4335 = vmatpush1.bf16.msra.mxu1 %v6613_v14  ;;  %v6694_v14 = vld [vmem:[#allocation5 + $0x1080] ss:$16 sps:$4 sm:$0xff]  }
 0x21a   :  { %4007 = vmatpush1.bf16.msra.mxu0 %v6610_v13  ;;  %4336 = vmatprep.subr.bf16.mxu1 %v6621_v17  ;;  %v6699_v13 = vld [vmem:[#allocation5 + $0xc8c] ss:$16 sps:$4 sm:$0xff]  }
 0x21b   :  { %4008 = vmatprep.subr.bf16.mxu0 %v6618_v15  ;;  %v6702_v15 = vld [vmem:[#allocation5 + $0x10a4] ss:$16 sps:$4 sm:$0xff]   ;;  %v6705_v17 = vld [vmem:[#allocation5 + $0xcac] ss:$16 sps:$4 sm:$0xff]  }
 0x21d   :  { %4337 = vmatpush1.bf16.msra.mxu1 %v6619_v19  ;;  %v6703_v19 = vld [vmem:[#allocation5 + $0xca8] ss:$16 sps:$4 sm:$0xff]  }
 0x21e   :  { %4009 = vmatpush1.bf16.msra.mxu0 %v6616_v18  ;;  %4338 = vmatprep.subr.bf16.mxu1 %v6627_v21  ;;  %v6700_v18 = vld [vmem:[#allocation5 + $0x10a0] ss:$16 sps:$4 sm:$0xff]   ;;  %v6711_v21 = vld [vmem:[#allocation5 + $0xccc] ss:$16 sps:$4 sm:$0xff]  }
 0x21f   :  { %4010 = vmatprep.subr.bf16.mxu0 %v6624_v20  ;;  %v6708_v20 = vld [vmem:[#allocation5 + $0x10c4] ss:$16 sps:$4 sm:$0xff]  }
 0x221   :  { %4339 = vmatpush1.bf16.msra.mxu1 %v6625_v24  ;;  %v6709_v24 = vld [vmem:[#allocation5 + $0xcc8] ss:$16 sps:$4 sm:$0xff]  }
 0x222   :  { %4011 = vmatpush1.bf16.msra.mxu0 %v6622_v22  ;;  %4340 = vmatprep.subr.bf16.mxu1 %v6633_v27  ;;  %v6706_v22 = vld [vmem:[#allocation5 + $0x10c0] ss:$16 sps:$4 sm:$0xff]   ;;  %v6717_v27 = vld [vmem:[#allocation5 + $0xcec] ss:$16 sps:$4 sm:$0xff]  }
 0x223   :  { %4012 = vmatprep.subr.bf16.mxu0 %v6630_v26  ;;  %v6714_v26 = vld [vmem:[#allocation5 + $0x10e4] ss:$16 sps:$4 sm:$0xff]  }
 0x225   :  { %4341 = vmatpush1.bf16.msra.mxu1 %v6631_v29  ;;  %v6715_v29 = vld [vmem:[#allocation5 + $0xce8] ss:$16 sps:$4 sm:$0xff]  }
 0x226   :  { %4013 = vmatpush1.bf16.msra.mxu0 %v6628_v28  ;;  %4342 = vmatprep.subr.bf16.mxu1 %v6639_v31  ;;  %v6712_v28 = vld [vmem:[#allocation5 + $0x10e0] ss:$16 sps:$4 sm:$0xff]   ;;  %v6723_v31 = vld [vmem:[#allocation5 + $0xd0c] ss:$16 sps:$4 sm:$0xff]  }
 0x227   :  { %4014 = vmatprep.subr.bf16.mxu0 %v6636_v30  ;;  %v6720_v30 = vld [vmem:[#allocation5 + $0x1104] ss:$16 sps:$4 sm:$0xff]  }
 0x229   :  { %4343 = vmatpush1.bf16.msra.mxu1 %v6637_v34  ;;  %v6721_v34 = vld [vmem:[#allocation5 + $0xd08] ss:$16 sps:$4 sm:$0xff]  }
 0x22a   :  { %4015 = vmatpush1.bf16.msra.mxu0 %v6634_v33  ;;  %4344 = vmatprep.subr.bf16.mxu1 %v6645_v52  ;;  %v6718_v33 = vld [vmem:[#allocation5 + $0x1100] ss:$16 sps:$4 sm:$0xff]   ;;  %v6729_v52 = vld [vmem:[#allocation5 + $0xd2c] ss:$16 sps:$4 sm:$0xff]  }
 0x22b   :  { %4016 = vmatprep.subr.bf16.mxu0 %v6642_v35  ;;  %v6726_v35 = vld [vmem:[#allocation5 + $0x1124] ss:$16 sps:$4 sm:$0xff]  }
 0x22d   :  { %4345 = vmatpush1.bf16.msra.mxu1 %v6643_v38  ;;  %v6727_v38 = vld [vmem:[#allocation5 + $0xd28] ss:$16 sps:$4 sm:$0xff]  }
 0x22e   :  { %4017 = vmatpush1.bf16.msra.mxu0 %v6640_v37  ;;  %4346 = vmatprep.subr.bf16.mxu1 %v6651_v40  ;;  %v6724_v37 = vld [vmem:[#allocation5 + $0x1120] ss:$16 sps:$4 sm:$0xff]   ;;  %v6735_v40 = vld [vmem:[#allocation5 + $0xd4c] ss:$16 sps:$4 sm:$0xff]  }
 0x22f   :  { %4018 = vmatprep.subr.bf16.mxu0 %v6648_v39  ;;  %v6732_v39 = vld [vmem:[#allocation5 + $0x1144] ss:$16 sps:$4 sm:$0xff]  }
 0x231   :  { %4347 = vmatpush1.bf16.msra.mxu1 %v6649_v36  ;;  %v6733_v36 = vld [vmem:[#allocation5 + $0xd48] ss:$16 sps:$4 sm:$0xff]  }
 0x232   :  { %4019 = vmatpush1.bf16.msra.mxu0 %v6646_v41  ;;  %4348 = vmatprep.subr.bf16.mxu1 %v6657_v43  ;;  %v6730_v41 = vld [vmem:[#allocation5 + $0x1140] ss:$16 sps:$4 sm:$0xff]   ;;  %v6741_v43 = vld [vmem:[#allocation5 + $0xd6c] ss:$16 sps:$4 sm:$0xff]  }
 0x233   :  { %4020 = vmatprep.subr.bf16.mxu0 %v6654_v16  ;;  %v6738_v16 = vld [vmem:[#allocation5 + $0x1164] ss:$16 sps:$4 sm:$0xff]  }
 0x235   :  { %4349 = vmatpush1.bf16.msra.mxu1 %v6655_v45  ;;  %v6739_v45 = vld [vmem:[#allocation5 + $0xd68] ss:$16 sps:$4 sm:$0xff]  }
 0x236   :  { %4021 = vmatpush1.bf16.msra.mxu0 %v6652_v44  ;;  %4350 = vmatprep.subr.bf16.mxu1 %v6663_v23  ;;  %v6736_v44 = vld [vmem:[#allocation5 + $0x1160] ss:$16 sps:$4 sm:$0xff]   ;;  %v6747_v23 = vld [vmem:[#allocation5 + $0xd8c] ss:$16 sps:$4 sm:$0xff]  }
 0x237   :  { %4022 = vmatprep.subr.bf16.mxu0 %v6660_v47  ;;  %v6744_v47 = vld [vmem:[#allocation5 + $0x1184] ss:$16 sps:$4 sm:$0xff]  }
 0x239   :  { %4351 = vmatpush1.bf16.msra.mxu1 %v6661_v49  ;;  %v6745_v49 = vld [vmem:[#allocation5 + $0xd88] ss:$16 sps:$4 sm:$0xff]  }
 0x23a   :  { %4023 = vmatpush1.bf16.msra.mxu0 %v6658_v48  ;;  %4352 = vmatprep.subr.bf16.mxu1 %v6669_v53  ;;  %v6742_v48 = vld [vmem:[#allocation5 + $0x1180] ss:$16 sps:$4 sm:$0xff]   ;;  %v6753_v53 = vld [vmem:[#allocation5 + $0xdac] ss:$16 sps:$4 sm:$0xff]  }
 0x23b   :  { %4024 = vmatprep.subr.bf16.mxu0 %v6666_v51  ;;  %v6750_v51 = vld [vmem:[#allocation5 + $0x11a4] ss:$16 sps:$4 sm:$0xff]  }
 0x23d   :  { %4353 = vmatpush1.bf16.msra.mxu1 %v6667_v54  ;;  %v6751_v54 = vld [vmem:[#allocation5 + $0xda8] ss:$16 sps:$4 sm:$0xff]  }
 0x23e   :  { %4025 = vmatpush1.bf16.msra.mxu0 %v6664_v25  ;;  %4363 = vmatprep.subr.bf16.mxu1 %v6675_v60  ;;  %v6748_v25 = vld [vmem:[#allocation5 + $0x11a0] ss:$16 sps:$4 sm:$0xff]  }
 0x23f   :  { %4035 = vmatprep.subr.bf16.mxu0 %v6672_v59  ;;  %v6759_v59 = vld [vmem:[#allocation5 + $0xdcc] ss:$16 sps:$4 sm:$0xff]   ;;  %v6754_v60 = vld [vmem:[#allocation5 + $0x11c0] ss:$16 sps:$4 sm:$0xff]  }
 0x240   :  { %4355 = vmatmul.mubr.bf16.vlgmr.msra.gmra.mrb[4].mxu1 %v7361_v42  ;;  %v6693_v42 = vld [vmem:[#allocation5 + $0xc6c] ss:$16 sps:$4 sm:$0xff]  }
 0x241   :  { %4027 = vmatmul.mubr.bf16.vlgmr.msra.gmra.mrb[0].mxu0 %v7377_v8  ;;  %4364 = vmatpush1.bf16.msra.mxu1 %v6673_v63  ;;  %v6765_v63 = vld [vmem:[#allocation5 + $0xdec] ss:$16 sps:$4 sm:$0xff]  }
 0x242   :  { %4036 = vmatpush1.bf16.msra.mxu0 %v6670_v62  ;;  %4365 = vmatprep.subr.bf16.mxu1 %v6681_v0  ;;  %v6762_v62 = vld [vmem:[#allocation5 + $0x11e4] ss:$16 sps:$4 sm:$0xff]   ;;  %v6763_v0 = vld [vmem:[#allocation5 + $0xde8] ss:$16 sps:$4 sm:$0xff]  }
 0x243   :  { %4037 = vmatprep.subr.bf16.mxu0 %v6678_v32  ;;  %4067 = vmatprep.mubr.bf16.mxu0 %v7379_v1  ;;  %v6760_v32 = vld [vmem:[#allocation5 + $0x11e0] ss:$16 sps:$4 sm:$0xff]  }
 0x244   :  { %4395 = vmatprep.mubr.bf16.mxu1 %v7363_v46  ;;  %v6697_v46 = vld [vmem:[#allocation5 + $0xc88] ss:$16 sps:$4 sm:$0xff]  }
 0x245   :  { %4366 = vmatpush1.bf16.msra.mxu1 %v6679_v3  ;;  %v6768_v3 = vld [vmem:[#allocation5 + $0x1204] ss:$16 sps:$4 sm:$0xff]  }
 0x246   :  { %4038 = vmatpush1.bf16.msra.mxu0 %v6676_v2  ;;  %4367 = vmatprep.subr.bf16.mxu1 %v6687_v5  ;;  %v131_v2 = vld [vmem:[#allocation2 + $0x80] sm:$0xff] }
 0x247   :  { %4039 = vmatprep.subr.bf16.mxu0 %v6684_v4  ;;  %v6771_v4 = vld [vmem:[#allocation5 + $0xe0c] ss:$16 sps:$4 sm:$0xff]   ;;  %v7385_v5 = vpack.c.bf16 %v131_v2, %v131_v2 }
 0x248   :  { %v6901_v2 = vld [vmem:[#allocation8 + $0x70] ss:$8 sps:$4 sm:$0xff]  }
 0x249   :  { %4368 = vmatpush1.bf16.msra.mxu1 %v6685_v6  ;;  %v6769_v6 = vld [vmem:[#allocation5 + $0xe08] ss:$16 sps:$4 sm:$0xff]  }
 0x24a   :  { %4040 = vmatpush1.bf16.msra.mxu0 %v6682_v11  ;;  %4369 = vmatprep.subr.bf16.mxu1 %v6693_v42  ;;  %v6766_v11 = vld [vmem:[#allocation5 + $0x1200] ss:$16 sps:$4 sm:$0xff]   ;;  %v6777_v42 = vld [vmem:[#allocation5 + $0xe2c] ss:$16 sps:$4 sm:$0xff]  }
 0x24b   :  { %4041 = vmatprep.subr.bf16.mxu0 %v6690_v7  ;;  %v6774_v7 = vld [vmem:[#allocation5 + $0x1224] ss:$16 sps:$4 sm:$0xff]  }
 0x24d   :  { %4370 = vmatpush1.bf16.msra.mxu1 %v6691_v10  ;;  %v6775_v10 = vld [vmem:[#allocation5 + $0xe28] ss:$16 sps:$4 sm:$0xff]  }
 0x24e   :  { %4042 = vmatpush1.bf16.msra.mxu0 %v6688_v9  ;;  %4371 = vmatprep.subr.bf16.mxu1 %v6699_v13  ;;  %v6772_v9 = vld [vmem:[#allocation5 + $0x1220] ss:$16 sps:$4 sm:$0xff]   ;;  %v6783_v13 = vld [vmem:[#allocation5 + $0xe4c] ss:$16 sps:$4 sm:$0xff]  }
 0x24f   :  { %4043 = vmatprep.subr.bf16.mxu0 %v6696_v12  ;;  %v6780_v12 = vld [vmem:[#allocation5 + $0x1244] ss:$16 sps:$4 sm:$0xff]  }
 0x251   :  { %4372 = vmatpush1.bf16.msra.mxu1 %v6697_v46  ;;  %v6778_v46 = vld [vmem:[#allocation5 + $0x1240] ss:$16 sps:$4 sm:$0xff]  }
 0x252   :  { %4044 = vmatpush1.bf16.msra.mxu0 %v6694_v14  ;;  %4373 = vmatprep.subr.bf16.mxu1 %v6705_v17  ;;  %v7191_v14 = vmov 0   ;;  %v133_v17 = vld [vmem:[#allocation2 + $0x90] sm:$0xff] }
 0x253   :  { %4045 = vmatprep.subr.bf16.mxu0 %v6702_v15  ;;  %v6781_v15 = vld [vmem:[#allocation5 + $0xe48] ss:$16 sps:$4 sm:$0xff]  }
 0x255   :  { %4374 = vmatpush1.bf16.msra.mxu1 %v6703_v19  ;;  %v152_v19 = vpack.c.bf16 %v133_v17, %v133_v17  ;;  %v6915_v17 = vld [vmem:[#allocation8 + $0xb4] ss:$8 sps:$4 sm:$0xff]  }
 0x256   :  { %4046 = vmatpush1.bf16.msra.mxu0 %v6700_v18  ;;  %4375 = vmatprep.subr.bf16.mxu1 %v6711_v21  ;;  %v6864_v18 = vld [vmem:[#allocation5 + $0x120c] ss:$16 sps:$4 sm:$0xff]   ;;  %v6862_v21 = vld [vmem:[#allocation5 + $0x1208] ss:$16 sps:$4 sm:$0xff]  }
 0x257   :  { %4047 = vmatprep.subr.bf16.mxu0 %v6708_v20  ;;  %v6784_v20 = vld [vmem:[#allocation5 + $0xe68] ss:$16 sps:$4 sm:$0xff]  }
 0x259   :  { %4376 = vmatpush1.bf16.msra.mxu1 %v6709_v24  ;;  %v6870_v24 = vld [vmem:[#allocation5 + $0x122c] ss:$16 sps:$4 sm:$0xff]  }
 0x25a   :  { %4048 = vmatpush1.bf16.msra.mxu0 %v6706_v22  ;;  %4377 = vmatprep.subr.bf16.mxu1 %v6717_v27  ;;  %v6789_v22 = vld [vmem:[#allocation5 + $0xe8c] ss:$16 sps:$4 sm:$0xff]  }
 0x25b   :  { %4049 = vmatprep.subr.bf16.mxu0 %v6714_v26  ;;  %v6868_v26 = vld [vmem:[#allocation5 + $0x1228] ss:$16 sps:$4 sm:$0xff]   ;;  %v6792_v27 = vld [vmem:[#allocation5 + $0xeac] ss:$16 sps:$4 sm:$0xff]  }
 0x25d   :  { %4378 = vmatpush1.bf16.msra.mxu1 %v6715_v29  ;;  %v6790_v29 = vld [vmem:[#allocation5 + $0xea8] ss:$16 sps:$4 sm:$0xff]  }
 0x25e   :  { %4050 = vmatpush1.bf16.msra.mxu0 %v6712_v28  ;;  %4379 = vmatprep.subr.bf16.mxu1 %v6723_v31  ;;  %v6876_v28 = vld [vmem:[#allocation5 + $0x124c] ss:$16 sps:$4 sm:$0xff]  }
 0x25f   :  { %4051 = vmatprep.subr.bf16.mxu0 %v6720_v30  ;;  %v6874_v30 = vld [vmem:[#allocation5 + $0x1248] ss:$16 sps:$4 sm:$0xff]   ;;  %v6795_v31 = vld [vmem:[#allocation5 + $0xecc] ss:$16 sps:$4 sm:$0xff]  }
 0x261   :  { %4380 = vmatpush1.bf16.msra.mxu1 %v6721_v34  ;;  %v6793_v34 = vld [vmem:[#allocation5 + $0xec8] ss:$16 sps:$4 sm:$0xff]  }
 0x262   :  { %4052 = vmatpush1.bf16.msra.mxu0 %v6718_v33  ;;  %4381 = vmatprep.subr.bf16.mxu1 %v6729_v52  ;;  %v6882_v33 = vld [vmem:[#allocation8 + $0x4] ss:$8 sps:$4 sm:$0xff]   ;;  %v6798_v52 = vld [vmem:[#allocation5 + $0xeec] ss:$16 sps:$4 sm:$0xff]  }
 0x263   :  { %4053 = vmatprep.subr.bf16.mxu0 %v6726_v35  ;;  %v6880_v35 = vld [vmem:[#allocation8] ss:$8 sps:$4 sm:$0xff]  }
 0x265   :  { %4382 = vmatpush1.bf16.msra.mxu1 %v6727_v38  ;;  %v6796_v38 = vld [vmem:[#allocation5 + $0xee8] ss:$16 sps:$4 sm:$0xff]  }
 0x266   :  { %4054 = vmatpush1.bf16.msra.mxu0 %v6724_v37  ;;  %4383 = vmatprep.subr.bf16.mxu1 %v6735_v40  ;;  %v6885_v37 = vld [vmem:[#allocation8 + $0x14] ss:$8 sps:$4 sm:$0xff]   ;;  %v6801_v40 = vld [vmem:[#allocation5 + $0xf0c] ss:$16 sps:$4 sm:$0xff]  }
 0x267   :  { %4055 = vmatprep.subr.bf16.mxu0 %v6732_v39  ;;  %v6883_v39 = vld [vmem:[#allocation8 + $0x10] ss:$8 sps:$4 sm:$0xff]  }
 0x269   :  { %4384 = vmatpush1.bf16.msra.mxu1 %v6733_v36  ;;  %v6799_v36 = vld [vmem:[#allocation5 + $0xf08] ss:$16 sps:$4 sm:$0xff]  }
 0x26a   :  { %4056 = vmatpush1.bf16.msra.mxu0 %v6730_v41  ;;  %4385 = vmatprep.subr.bf16.mxu1 %v6741_v43  ;;  %v6888_v41 = vld [vmem:[#allocation8 + $0x24] ss:$8 sps:$4 sm:$0xff]   ;;  %v6804_v43 = vld [vmem:[#allocation5 + $0xf2c] ss:$16 sps:$4 sm:$0xff]  }
 0x26b   :  { %4057 = vmatprep.subr.bf16.mxu0 %v6738_v16  ;;  %v6886_v16 = vld [vmem:[#allocation8 + $0x20] ss:$8 sps:$4 sm:$0xff]  }
 0x26d   :  { %4386 = vmatpush1.bf16.msra.mxu1 %v6739_v45  ;;  %v6802_v45 = vld [vmem:[#allocation5 + $0xf28] ss:$16 sps:$4 sm:$0xff]  }
 0x26e   :  { %4058 = vmatpush1.bf16.msra.mxu0 %v6736_v44  ;;  %4387 = vmatprep.subr.bf16.mxu1 %v6747_v23  ;;  %v6891_v44 = vld [vmem:[#allocation8 + $0x34] ss:$8 sps:$4 sm:$0xff]   ;;  %v6807_v23 = vld [vmem:[#allocation5 + $0xf4c] ss:$16 sps:$4 sm:$0xff]  }
 0x26f   :  { %4059 = vmatprep.subr.bf16.mxu0 %v6744_v47  ;;  %v6889_v47 = vld [vmem:[#allocation8 + $0x30] ss:$8 sps:$4 sm:$0xff]  }
 0x271   :  { %4388 = vmatpush1.bf16.msra.mxu1 %v6745_v49  ;;  %v6805_v49 = vld [vmem:[#allocation5 + $0xf48] ss:$16 sps:$4 sm:$0xff]  }
 0x272   :  { %4060 = vmatpush1.bf16.msra.mxu0 %v6742_v48  ;;  %4389 = vmatprep.subr.bf16.mxu1 %v6753_v53  ;;  %v6894_v48 = vld [vmem:[#allocation8 + $0x44] ss:$8 sps:$4 sm:$0xff]   ;;  %v6810_v53 = vld [vmem:[#allocation5 + $0xf6c] ss:$16 sps:$4 sm:$0xff]  }
 0x273   :  { %4061 = vmatprep.subr.bf16.mxu0 %v6750_v51  ;;  %v6892_v51 = vld [vmem:[#allocation8 + $0x40] ss:$8 sps:$4 sm:$0xff]  }
 0x275   :  { %4390 = vmatpush1.bf16.msra.mxu1 %v6751_v54  ;;  %v6808_v54 = vld [vmem:[#allocation5 + $0xf68] ss:$16 sps:$4 sm:$0xff]  }
 0x276   :  { %4062 = vmatpush1.bf16.msra.mxu0 %v6748_v25  ;;  %4391 = vmatprep.subr.bf16.mxu1 %v6759_v59  ;;  %v6897_v25 = vld [vmem:[#allocation8 + $0x54] ss:$8 sps:$4 sm:$0xff]   ;;  %v6813_v59 = vld [vmem:[#allocation5 + $0xf8c] ss:$16 sps:$4 sm:$0xff]  }
 0x277   :  { %4063 = vmatprep.subr.bf16.mxu0 %v6756_v58  ;;  %v6895_v58 = vld [vmem:[#allocation8 + $0x50] ss:$8 sps:$4 sm:$0xff]  }
 0x279   :  { %4392 = vmatpush1.bf16.msra.mxu1 %v6757_v61  ;;  %v6811_v61 = vld [vmem:[#allocation5 + $0xf88] ss:$16 sps:$4 sm:$0xff]  }
 0x27a   :  { %4064 = vmatpush1.bf16.msra.mxu0 %v6754_v60  ;;  %4393 = vmatprep.subr.bf16.mxu1 %v6765_v63  ;;  %v6900_v60 = vld [vmem:[#allocation8 + $0x64] ss:$8 sps:$4 sm:$0xff]   ;;  %v6816_v63 = vld [vmem:[#allocation5 + $0xfac] ss:$16 sps:$4 sm:$0xff]  }
 0x27b   :  { %4065 = vmatprep.subr.bf16.mxu0 %v6762_v62  ;;  %v6898_v62 = vld [vmem:[#allocation8 + $0x60] ss:$8 sps:$4 sm:$0xff]  }
 0x27d   :  { %4394 = vmatpush1.bf16.msra.mxu1 %v6763_v0  ;;  %v6814_v0 = vld [vmem:[#allocation5 + $0xfa8] ss:$16 sps:$4 sm:$0xff]  }
 0x27e   :  { %4066 = vmatpush1.bf16.msra.mxu0 %v6760_v32  ;;  %4404 = vmatprep.subr.bf16.mxu1 %v6771_v4  ;;  %v6903_v32 = vld [vmem:[#allocation8 + $0x74] ss:$8 sps:$4 sm:$0xff]   ;;  %v6906_v4 = vld [vmem:[#allocation8 + $0x84] ss:$8 sps:$4 sm:$0xff]  }
 0x27f   :  { %4076 = vmatprep.subr.bf16.mxu0 %v6768_v3  ;;  %v6819_v3 = vld [vmem:[#allocation5 + $0xfcc] ss:$16 sps:$4 sm:$0xff]  }
 0x280   :  { %4396 = vmatmul.mubr.bf16.vlgmr.msra.gmra.mrb[4].mxu1 %v7369_v50  ;;  %v6786_v50 = vld [vmem:[#allocation5 + $0xe6c] ss:$16 sps:$4 sm:$0xff]  }
 0x281   :  { %4068 = vmatmul.mubr.bf16.vlgmr.msra.gmra.mrb[0].mxu0 %v7385_v5  ;;  %4405 = vmatpush1.bf16.msra.mxu1 %v6769_v6  ;;  %v6904_v6 = vld [vmem:[#allocation8 + $0x80] ss:$8 sps:$4 sm:$0xff]  }
 0x282   :  { %4077 = vmatpush1.bf16.msra.mxu0 %v6766_v11  ;;  %4406 = vmatprep.subr.bf16.mxu1 %v6777_v42  ;;  %v6817_v11 = vld [vmem:[#allocation5 + $0xfc8] ss:$16 sps:$4 sm:$0xff]  }
 0x283   :  { %4078 = vmatprep.subr.bf16.mxu0 %v6774_v7  ;;  %4108 = vmatprep.mubr.bf16.mxu0 %v7191_v14  ;;  %v6822_v7 = vld [vmem:[#allocation5 + $0xfec] ss:$16 sps:$4 sm:$0xff]   ;;  %v6909_v42 = vld [vmem:[#allocation8 + $0x94] ss:$8 sps:$4 sm:$0xff]  }
 0x284   :  { %4436 = vmatprep.mubr.bf16.mxu1 %v7371_v57  ;;  %v6787_v57 = vld [vmem:[#allocation5 + $0xe88] ss:$16 sps:$4 sm:$0xff]  }
 0x285   :  { %4407 = vmatpush1.bf16.msra.mxu1 %v6775_v10  ;;  %v6907_v10 = vld [vmem:[#allocation8 + $0x90] ss:$8 sps:$4 sm:$0xff]  }
 0x286   :  { %4079 = vmatpush1.bf16.msra.mxu0 %v6772_v9  ;;  %4408 = vmatprep.subr.bf16.mxu1 %v6783_v13  ;;  %v6820_v9 = vld [vmem:[#allocation5 + $0xfe8] ss:$16 sps:$4 sm:$0xff]  }
 0x287   :  { %4080 = vmatprep.subr.bf16.mxu0 %v6780_v12  ;;  %v6825_v12 = vld [vmem:[#allocation5 + $0x100c] ss:$16 sps:$4 sm:$0xff]   ;;  %v6912_v13 = vld [vmem:[#allocation8 + $0xa4] ss:$8 sps:$4 sm:$0xff]  }
 0x289   :  { %4409 = vmatpush1.bf16.msra.mxu1 %v6781_v15  ;;  %v6910_v15 = vld [vmem:[#allocation8 + $0xa0] ss:$8 sps:$4 sm:$0xff]  }
 0x28a   :  { %4081 = vmatpush1.bf16.msra.mxu0 %v6778_v46  ;;  %4410 = vmatprep.subr.bf16.mxu1 %v6786_v50  ;;  %v6828_v46 = vld [vmem:[#allocation5 + $0x102c] ss:$16 sps:$4 sm:$0xff]   ;;  %v6826_v50 = vld [vmem:[#allocation5 + $0x1028] ss:$16 sps:$4 sm:$0xff]  }
 0x28b   :  { %4486 = vmatprep.subr.bf16.mxu0 %v6864_v18  ;;  %v6831_v18 = vld [vmem:[#allocation5 + $0x104c] ss:$16 sps:$4 sm:$0xff]  }
 0x28d   :  { %5800 = vmatmul.mubr.msk.bf16.vlgmr.msra.gmra.mrb[0].mxu0 %vm3703_vm0, %v152_v19  ;;  %4411 = vmatpush1.bf16.msra.mxu1 %v6784_v20  ;;  %v6918_v20 = vld [vmem:[#allocation8 + $0xc4] ss:$8 sps:$4 sm:$0xff]  }
 0x28e   :  { %4487 = vmatpush1.bf16.msra.mxu0 %v6862_v21  ;;  %4412 = vmatprep.subr.bf16.mxu1 %v6789_v22  ;;  %v6829_v21 = vld [vmem:[#allocation5 + $0x1048] ss:$16 sps:$4 sm:$0xff]   ;;  %v6834_v22 = vld [vmem:[#allocation5 + $0x106c] ss:$16 sps:$4 sm:$0xff]  }
 0x28f   :  { %4488 = vmatprep.subr.bf16.mxu0 %v6870_v24  ;;  %4518 = vmatprep.mubr.bf16.mxu0 %v7191_v14  ;;  %v6823_v14 = vld [vmem:[#allocation5 + $0x1008] ss:$16 sps:$4 sm:$0xff]   ;;  %v6916_v24 = vld [vmem:[#allocation8 + $0xc0] ss:$8 sps:$4 sm:$0xff]  }
 0x291   :  { %4413 = vmatpush1.bf16.msra.mxu1 %v6787_v57  ;;  %v6921_v57 = vld [vmem:[#allocation8 + $0xd4] ss:$8 sps:$4 sm:$0xff]  }
 0x292   :  { %4489 = vmatpush1.bf16.msra.mxu0 %v6868_v26  ;;  %4414 = vmatprep.subr.bf16.mxu1 %v6792_v27  ;;  %v6837_v26 = vld [vmem:[#allocation5 + $0x108c] ss:$16 sps:$4 sm:$0xff]   ;;  %v6835_v27 = vld [vmem:[#allocation5 + $0x1088] ss:$16 sps:$4 sm:$0xff]  }
 0x293   :  { %4490 = vmatprep.subr.bf16.mxu0 %v6876_v28  ;;  %v6840_v28 = vld [vmem:[#allocation5 + $0x10ac] ss:$16 sps:$4 sm:$0xff]  }
 0x295   :  { %4415 = vmatpush1.bf16.msra.mxu1 %v6790_v29  ;;  %v6838_v29 = vld [vmem:[#allocation5 + $0x10a8] ss:$16 sps:$4 sm:$0xff]  }
 0x296   :  { %4491 = vmatpush1.bf16.msra.mxu0 %v6874_v30  ;;  %4416 = vmatprep.subr.bf16.mxu1 %v6795_v31  ;;  %v6843_v30 = vld [vmem:[#allocation5 + $0x10cc] ss:$16 sps:$4 sm:$0xff]   ;;  %v6841_v31 = vld [vmem:[#allocation5 + $0x10c8] ss:$16 sps:$4 sm:$0xff]  }
 0x297   :  { %4931 = vmatprep.subr.bf16.mxu0 %v6882_v33  ;;  %v6846_v33 = vld [vmem:[#allocation5 + $0x10ec] ss:$16 sps:$4 sm:$0xff]  }
 0x299   :  { %5801 = vmatmul.mubr.msk.bf16.vlgmr.msra.gmra.mrb[4].mxu0 %vm3703_vm0, %v152_v19  ;;  %4417 = vmatpush1.bf16.msra.mxu1 %v6793_v34  ;;  %v6913_v19 = vld [vmem:[#allocation8 + $0xb0] ss:$8 sps:$4 sm:$0xff]   ;;  %v6844_v34 = vld [vmem:[#allocation5 + $0x10e8] ss:$16 sps:$4 sm:$0xff]  }
 0x29a   :  { %4932 = vmatpush1.bf16.msra.mxu0 %v6880_v35  ;;  %4418 = vmatprep.subr.bf16.mxu1 %v6798_v52  ;;  %v6849_v35 = vld [vmem:[#allocation5 + $0x110c] ss:$16 sps:$4 sm:$0xff]   ;;  %v6847_v52 = vld [vmem:[#allocation5 + $0x1108] ss:$16 sps:$4 sm:$0xff]  }
 0x29b   :  { %4933 = vmatprep.subr.bf16.mxu0 %v6885_v37  ;;  %v6852_v37 = vld [vmem:[#allocation5 + $0x112c] ss:$16 sps:$4 sm:$0xff]  }
 0x29d   :  { %4419 = vmatpush1.bf16.msra.mxu1 %v6796_v38  ;;  %v6924_v38 = vld [vmem:[#allocation8 + $0xe4] ss:$8 sps:$4 sm:$0xff]  }
 0x29e   :  { %4934 = vmatpush1.bf16.msra.mxu0 %v6883_v39  ;;  %4420 = vmatprep.subr.bf16.mxu1 %v6801_v40  ;;  %v6922_v39 = vld [vmem:[#allocation8 + $0xe0] ss:$8 sps:$4 sm:$0xff]   ;;  %v6850_v40 = vld [vmem:[#allocation5 + $0x1128] ss:$16 sps:$4 sm:$0xff]  }
 0x29f   :  { %4935 = vmatprep.subr.bf16.mxu0 %v6888_v41  ;;  %v6855_v41 = vld [vmem:[#allocation5 + $0x114c] ss:$16 sps:$4 sm:$0xff]  }
 0x2a1   :  { %4421 = vmatpush1.bf16.msra.mxu1 %v6799_v36  ;;  %v6927_v36 = vld [vmem:[#allocation8 + $0xf4] ss:$8 sps:$4 sm:$0xff]  }
 0x2a2   :  { %4936 = vmatpush1.bf16.msra.mxu0 %v6886_v16  ;;  %4422 = vmatprep.subr.bf16.mxu1 %v6804_v43  ;;  %v6925_v16 = vld [vmem:[#allocation8 + $0xf0] ss:$8 sps:$4 sm:$0xff]   ;;  %v6853_v43 = vld [vmem:[#allocation5 + $0x1148] ss:$16 sps:$4 sm:$0xff]  }
 0x2a3   :  { %4937 = vmatprep.subr.bf16.mxu0 %v6891_v44  ;;  %v6858_v44 = vld [vmem:[#allocation5 + $0x116c] ss:$16 sps:$4 sm:$0xff]  }
 0x2a5   :  { %4423 = vmatpush1.bf16.msra.mxu1 %v6802_v45  ;;  %v6930_v45 = vld [vmem:[#allocation8 + $0x104] ss:$8 sps:$4 sm:$0xff]  }
 0x2a6   :  { %4938 = vmatpush1.bf16.msra.mxu0 %v6889_v47  ;;  %4424 = vmatprep.subr.bf16.mxu1 %v6807_v23  ;;  %v6856_v47 = vld [vmem:[#allocation5 + $0x1168] ss:$16 sps:$4 sm:$0xff]   ;;  %v6861_v23 = vld [vmem:[#allocation5 + $0x118c] ss:$16 sps:$4 sm:$0xff]  }
 0x2a7   :  { %4939 = vmatprep.subr.bf16.mxu0 %v6894_v48  ;;  %v6859_v48 = vld [vmem:[#allocation5 + $0x1188] ss:$16 sps:$4 sm:$0xff]  }
 0x2a9   :  { %4425 = vmatpush1.bf16.msra.mxu1 %v6805_v49  ;;  %v6867_v49 = vld [vmem:[#allocation5 + $0x11ac] ss:$16 sps:$4 sm:$0xff]  }
 0x2aa   :  { %4940 = vmatpush1.bf16.msra.mxu0 %v6892_v51  ;;  %4426 = vmatprep.subr.bf16.mxu1 %v6810_v53  ;;  %v6865_v51 = vld [vmem:[#allocation5 + $0x11a8] ss:$16 sps:$4 sm:$0xff]   ;;  %v6873_v53 = vld [vmem:[#allocation5 + $0x11cc] ss:$16 sps:$4 sm:$0xff]  }
 0x2ab   :  { %4941 = vmatprep.subr.bf16.mxu0 %v6897_v25  ;;  %v6871_v25 = vld [vmem:[#allocation5 + $0x11c8] ss:$16 sps:$4 sm:$0xff]  }
 0x2ad   :  { %4427 = vmatpush1.bf16.msra.mxu1 %v6808_v54  ;;  %v6879_v54 = vld [vmem:[#allocation5 + $0x11ec] ss:$16 sps:$4 sm:$0xff]  }
 0x2ae   :  { %4942 = vmatpush1.bf16.msra.mxu0 %v6895_v58  ;;  %4428 = vmatprep.subr.bf16.mxu1 %v6813_v59  ;;  %v6877_v58 = vld [vmem:[#allocation5 + $0x11e8] ss:$16 sps:$4 sm:$0xff]   ;;  %v743_v59 = vlaneseq }
 0x2af   :  { %4943 = vmatprep.subr.bf16.mxu0 %v6900_v60 }
 0x2b0   :  { %v7395_v60 = vshrl.u32 %v743_v59, 7  ;;  %v6975_v59 = vld [vmem:[#allocation8 + $0x1f4] ss:$8 sps:$4 sm:$0xff]  }
 0x2b1   :  { %4429 = vmatpush1.bf16.msra.mxu1 %v6811_v61 }
 0x2b2   :  { %4944 = vmatpush1.bf16.msra.mxu0 %v6898_v62  ;;  %4430 = vmatprep.subr.bf16.mxu1 %v6816_v63  ;;  %v745_v61 = vsub.s32 0, %v7395_v60  ;;  %v7398_v62 = vld [vmem:[#allocation7] sm:$0xf]  ;;  %v749_v63 = vsub.s32 1, %v7395_v60 }
 0x2b3   :  { %4945 = vmatprep.subr.bf16.mxu0 %v6903_v32 }
 0x2b4   :  { %v746_v32 = vrot.slane %v7398_v62, %v745_v61 }
 0x2b5   :  { %4431 = vmatpush1.bf16.msra.mxu1 %v6814_v0  ;;  %v750_v0 = vrot.slane %v7398_v62, %v749_v63 }
 0x2b6   :  { %4946 = vmatpush1.bf16.msra.mxu0 %v6901_v2  ;;  %4432 = vmatprep.subr.bf16.mxu1 %v6819_v3  ;;  %v3742_v2 = vadd.f32 %v7357_v55, %v746_v32  ;;  %v6977_v3 = vld [vmem:[#allocation11] sm:$0xff]   ;;  %v6973_v32 = vld [vmem:[#allocation8 + $0x1f0] ss:$8 sps:$4 sm:$0xff]  }
 0x2b7   :  { %4947 = vmatprep.subr.bf16.mxu0 %v6906_v4  ;;  %v6978_v4 = vld [vmem:[#allocation11 + $0x48] sm:$0xff]  }
 0x2b8   :  { %v6928_v55 = vld [vmem:[#allocation8 + $0x100] ss:$8 sps:$4 sm:$0xff]  }
 0x2b9   :  { %4433 = vmatpush1.bf16.msra.mxu1 %v6817_v11  ;;  %v3744_v11 = vadd.f32 %v7359_v56, %v750_v0  ;;  %v6982_v56 = vld [vmem:[#allocation11 + $0x58] sm:$0xff]   ;;  %v753_v0 = vsub.s32 2, %v7395_v60 }
 0x2ba   :  { %4948 = vmatpush1.bf16.msra.mxu0 %v6904_v6  ;;  %4434 = vmatprep.subr.bf16.mxu1 %v6822_v7 }
 0x2bb   :  { %4949 = vmatprep.subr.bf16.mxu0 %v6909_v42 }
 0x2bd   :  { %4435 = vmatpush1.bf16.msra.mxu1 %v6820_v9 }
 0x2be   :  { %4950 = vmatpush1.bf16.msra.mxu0 %v6907_v10  ;;  %4445 = vmatprep.subr.bf16.mxu1 %v6825_v12  ;;  %v6979_v12 = vld [vmem:[#allocation11 + $0x8] sm:$0xff]  }
 0x2bf   :  { %4951 = vmatprep.subr.bf16.mxu0 %v6912_v13 }
 0x2c0   :  { %4437 = vmatmul.mubr.bf16.vlgmr.msra.gmra.mrb[4].mxu1 %v7377_v8  ;;  %v6832_v8 = vld [vmem:[#allocation5 + $0x1068] ss:$16 sps:$4 sm:$0xff]  }
 0x2c1   :  { %4446 = vmatpush1.bf16.msra.mxu1 %v6823_v14  ;;  %4477 = vmatprep.mubr.bf16.mxu1 %v7379_v1  ;;  %v6919_v1 = vld [vmem:[#allocation8 + $0xd0] ss:$8 sps:$4 sm:$0xff]  }
 0x2c2   :  { %4447 = vmatprep.subr.bf16.mxu1 %v6828_v46  ;;  %4952 = vmatpush1.bf16.msra.mxu0 %v6910_v15  ;;  %v6980_v46 = vld [vmem:[#allocation11 + $0x50] sm:$0xff]  }
 0x2c3   :  { %4953 = vmatprep.subr.bf16.mxu0 %v6915_v17 }
 0x2c5   :  { %4448 = vmatpush1.bf16.msra.mxu1 %v6826_v50  ;;  %v6981_v50 = vld [vmem:[#allocation11 + $0x10] sm:$0xff]  }
 0x2c6   :  { %4449 = vmatprep.subr.bf16.mxu1 %v6831_v18  ;;  %4954 = vmatpush1.bf16.msra.mxu0 %v6913_v19  ;;  %v6933_v19 = vld [vmem:[#allocation8 + $0x114] ss:$8 sps:$4 sm:$0xff]  }
 0x2c7   :  { %4955 = vmatprep.subr.bf16.mxu0 %v6918_v20  ;;  %v6931_v20 = vld [vmem:[#allocation8 + $0x110] ss:$8 sps:$4 sm:$0xff]  }
 0x2c9   :  { %4450 = vmatpush1.bf16.msra.mxu1 %v6829_v21  ;;  %v6983_v21 = vld [vmem:[#allocation11 + $0x18] sm:$0xff]  }
 0x2ca   :  { %4451 = vmatprep.subr.bf16.mxu1 %v6834_v22  ;;  %4956 = vmatpush1.bf16.msra.mxu0 %v6916_v24  ;;  %v6936_v22 = vld [vmem:[#allocation8 + $0x124] ss:$8 sps:$4 sm:$0xff]  }
 0x2cb   :  { %4957 = vmatprep.subr.bf16.mxu0 %v6921_v57  ;;  %v6984_v24 = vld [vmem:[#allocation11 + $0x60] sm:$0xff]  }
 0x2cd   :  { %4452 = vmatpush1.bf16.msra.mxu1 %v6832_v8 }
 0x2ce   :  { %4453 = vmatprep.subr.bf16.mxu1 %v6837_v26  ;;  %4958 = vmatpush1.bf16.msra.mxu0 %v6919_v1  ;;  %v6934_v26 = vld [vmem:[#allocation8 + $0x120] ss:$8 sps:$4 sm:$0xff]  }
 0x2cf   :  { %4959 = vmatprep.subr.bf16.mxu0 %v6924_v38  ;;  %v6948_v38 = vld [vmem:[#allocation8 + $0x164] ss:$8 sps:$4 sm:$0xff]  }
 0x2d1   :  { %4454 = vmatpush1.bf16.msra.mxu1 %v6835_v27  ;;  %v6985_v27 = vld [vmem:[#allocation11 + $0x20] sm:$0xff]  }
 0x2d2   :  { %4455 = vmatprep.subr.bf16.mxu1 %v6840_v28  ;;  %4960 = vmatpush1.bf16.msra.mxu0 %v6922_v39  ;;  %v6939_v28 = vld [vmem:[#allocation8 + $0x134] ss:$8 sps:$4 sm:$0xff]   ;;  %v6946_v39 = vld [vmem:[#allocation8 + $0x160] ss:$8 sps:$4 sm:$0xff]  }
 0x2d3   :  { %4961 = vmatprep.subr.bf16.mxu0 %v6927_v36  ;;  %v6954_v36 = vld [vmem:[#allocation8 + $0x184] ss:$8 sps:$4 sm:$0xff]  }
 0x2d5   :  { %4456 = vmatpush1.bf16.msra.mxu1 %v6838_v29 }
 0x2d6   :  { %4457 = vmatprep.subr.bf16.mxu1 %v6843_v30  ;;  %4962 = vmatpush1.bf16.msra.mxu0 %v6925_v16  ;;  %v6986_v30 = vld [vmem:[#allocation11 + $0x68] sm:$0xff]  }
 0x2d7   :  { %4972 = vmatprep.subr.bf16.mxu0 %v6930_v45  ;;  %v6952_v16 = vld [vmem:[#allocation8 + $0x180] ss:$8 sps:$4 sm:$0xff]   ;;  %v6960_v45 = vld [vmem:[#allocation8 + $0x1a4] ss:$8 sps:$4 sm:$0xff]  }
 0x2d9   :  { %4458 = vmatpush1.bf16.msra.mxu1 %v6841_v31  ;;  %v6937_v31 = vld [vmem:[#allocation8 + $0x130] ss:$8 sps:$4 sm:$0xff]  }
 0x2da   :  { %4459 = vmatprep.subr.bf16.mxu1 %v6846_v33  ;;  %v6987_v33 = vld [vmem:[#allocation11 + $0x28] sm:$0xff]  }
 0x2dd   :  { %4460 = vmatpush1.bf16.msra.mxu1 %v6844_v34  ;;  %v6942_v34 = vld [vmem:[#allocation8 + $0x144] ss:$8 sps:$4 sm:$0xff]  }
 0x2de   :  { %4461 = vmatprep.subr.bf16.mxu1 %v6849_v35  ;;  %v6940_v35 = vld [vmem:[#allocation8 + $0x140] ss:$8 sps:$4 sm:$0xff]  }
 0x2e1   :  { %4462 = vmatpush1.bf16.msra.mxu1 %v6847_v52  ;;  %v6945_v52 = vld [vmem:[#allocation8 + $0x154] ss:$8 sps:$4 sm:$0xff]  }
 0x2e2   :  { %4463 = vmatprep.subr.bf16.mxu1 %v6852_v37  ;;  %v6943_v37 = vld [vmem:[#allocation8 + $0x150] ss:$8 sps:$4 sm:$0xff]  }
 0x2e5   :  { %4464 = vmatpush1.bf16.msra.mxu1 %v6850_v40  ;;  %v6951_v40 = vld [vmem:[#allocation8 + $0x174] ss:$8 sps:$4 sm:$0xff]  }
 0x2e6   :  { %4465 = vmatprep.subr.bf16.mxu1 %v6855_v41  ;;  %v6949_v41 = vld [vmem:[#allocation8 + $0x170] ss:$8 sps:$4 sm:$0xff]  }
 0x2e9   :  { %4466 = vmatpush1.bf16.msra.mxu1 %v6853_v43  ;;  %v6957_v43 = vld [vmem:[#allocation8 + $0x194] ss:$8 sps:$4 sm:$0xff]  }
 0x2ea   :  { %4467 = vmatprep.subr.bf16.mxu1 %v6858_v44  ;;  %v6955_v44 = vld [vmem:[#allocation8 + $0x190] ss:$8 sps:$4 sm:$0xff]  }
 0x2ed   :  { %4468 = vmatpush1.bf16.msra.mxu1 %v6856_v47  ;;  %v6958_v47 = vld [vmem:[#allocation8 + $0x1a0] ss:$8 sps:$4 sm:$0xff]  }
 0x2ee   :  { %4469 = vmatprep.subr.bf16.mxu1 %v6861_v23  ;;  %v6963_v23 = vld [vmem:[#allocation8 + $0x1b4] ss:$8 sps:$4 sm:$0xff]  }
 0x2f1   :  { %4470 = vmatpush1.bf16.msra.mxu1 %v6859_v48  ;;  %v6961_v48 = vld [vmem:[#allocation8 + $0x1b0] ss:$8 sps:$4 sm:$0xff]  }
 0x2f2   :  { %4471 = vmatprep.subr.bf16.mxu1 %v6867_v49  ;;  %v6966_v49 = vld [vmem:[#allocation8 + $0x1c4] ss:$8 sps:$4 sm:$0xff]  }
 0x2f5   :  { %4472 = vmatpush1.bf16.msra.mxu1 %v6865_v51  ;;  %v6964_v51 = vld [vmem:[#allocation8 + $0x1c0] ss:$8 sps:$4 sm:$0xff]  }
 0x2f6   :  { %4473 = vmatprep.subr.bf16.mxu1 %v6873_v53  ;;  %v6969_v53 = vld [vmem:[#allocation8 + $0x1d4] ss:$8 sps:$4 sm:$0xff]  }
 0x2f9   :  { %4474 = vmatpush1.bf16.msra.mxu1 %v6871_v25  ;;  %v6967_v25 = vld [vmem:[#allocation8 + $0x1d0] ss:$8 sps:$4 sm:$0xff]  }
 0x2fa   :  { %4475 = vmatprep.subr.bf16.mxu1 %v6879_v54  ;;  %v6972_v54 = vld [vmem:[#allocation8 + $0x1e4] ss:$8 sps:$4 sm:$0xff]  }
 0x2fd   :  { %4476 = vmatpush1.bf16.msra.mxu1 %v6877_v58  ;;  %v6970_v58 = vld [vmem:[#allocation8 + $0x1e0] ss:$8 sps:$4 sm:$0xff]  }
 0x300   :  { %4478 = vmatmul.mubr.bf16.vlgmr.msra.gmra.mrb[4].mxu1 %v7385_v5  ;;  %v6976_v5 = vld [vmem:[#allocation11 + $0x40] sm:$0xff]  }
 0x301   :  { %5883 = vmatprep.subr.bf16.mxu1 %v6976_v5  ;;  %v754_v5 = vrot.slane %v7398_v62, %v753_v0 }
 0x302   :  { %5884 = vmatpush3.bf16.msra.mxu1 %v6977_v3 }
 0x303   :  { %5885 = vmatprep.subr.bf16.mxu1 %v6978_v4 }
 0x306   :  { %5886 = vmatpush3.bf16.msra.mxu1 %v6979_v12 }
 0x307   :  { %5887 = vmatprep.subr.bf16.mxu1 %v6980_v46 }
 0x30a   :  { %5888 = vmatpush3.bf16.msra.mxu1 %v6981_v50  ;;  %v6991_v50 = vld [vmem:[#allocation11 + $0x38] sm:$0xff]  }
 0x30b   :  { %5889 = vmatprep.subr.bf16.mxu1 %v6982_v56 }
 0x30e   :  { %5890 = vmatpush3.bf16.msra.mxu1 %v6983_v21 }
 0x30f   :  { %5891 = vmatprep.subr.bf16.mxu1 %v6984_v24 }
 0x312   :  { %5892 = vmatpush3.bf16.msra.mxu1 %v6985_v27 }
 0x313   :  { %5893 = vmatprep.subr.bf16.mxu1 %v6986_v30  ;;  %v5866_v30 = vld [vmem:[#allocation13] ss:$0 sm:$0xff] }
 0x316   :  { %5894 = vmatpush3.bf16.msra.mxu1 %v6987_v33 }
 0x360   :  { %v4110_v6 = vpop.f32.mrb[0].mxu0 }
 0x361   :  { %v5906_v7 = vadd.f32 %v4110_v6, %v3742_v2  ;;  %v4112_v42 = vpop.f32.mrb[1].mxu0  ;;  %v757_v2 = vsub.s32 3, %v7395_v60 }
 0x362   :  { %v5908_v9 = vadd.f32 %v4112_v42, %v3744_v11  ;;  %v4114_v10 = vpop.f32.mrb[2].mxu0 }
 0x363   :  { %v4527_v13 = vmax.f32 %v5906_v7, 0.0  ;;  %v4115_v14 = vpop.f32.mrb[3].mxu0  ;;  %v758_v3 = vrot.slane %v7398_v62, %v757_v2  ;;  %v6990_v62 = vld [vmem:[#allocation11 + $0x78] sm:$0xff]  }
 0x364   :  { %v4528_v15 = vmax.f32 %v5908_v9, 0.0 }
 0x365   :  { %v4531_v18 = vpack.c.bf16 %v4527_v13, %v4527_v13 }
 0x366   :  { %v4532_v17 = vpack.c.bf16 %v4528_v15, %v4528_v15 }
 0x368   :  { %4963 = vmatprep.mubr.bf16.mxu0 %v4532_v17  ;;  %v6988_v17 = vld [vmem:[#allocation11 + $0x70] sm:$0xff]  }
 0x369   :  { %4964 = vmatmul.mubr.bf16.vlgmr.msra.gmra.mrb[8].mxu0 %v4531_v18  ;;  %5895 = vmatprep.subr.bf16.mxu1 %v6988_v17  ;;  %v4599_v18 = vld [vmem:[#allocation10] sm:$0x3] }
 0x36a   :  { %4973 = vmatpush1.bf16.msra.mxu0 %v6928_v55  ;;  %v6989_v55 = vld [vmem:[#allocation11 + $0x30] sm:$0xff]   ;;  %v4608_v56 = vrot.slane %v4599_v18, %v749_v63 }
 0x36b   :  { %4974 = vmatprep.subr.bf16.mxu0 %v6933_v19  ;;  %5896 = vmatpush3.bf16.msra.mxu1 %v6989_v55  ;;  %v4604_v19 = vrot.slane %v4599_v18, %v745_v61 }
 0x36c   :  { %v7409_v57 = vpop.f32.mrb[4].mxu0  ;;  %5897 = vmatprep.subr.bf16.mxu1 %v6990_v62 }
 0x36d   :  { %v7411_v8 = vpop.f32.mrb[5].mxu0 }
 0x36e   :  { %4975 = vmatpush1.bf16.msra.mxu0 %v6931_v20  ;;  %v4524_v1 = vpop.f32.mrb[6].mxu0 }
 0x36f   :  { %4976 = vmatprep.subr.bf16.mxu0 %v6936_v22  ;;  %v4525_v29 = vpop.f32.mrb[7].mxu0  ;;  %5898 = vmatpush3.bf16.msra.mxu1 %v6991_v50 }
 0x372   :  { %4977 = vmatpush1.bf16.msra.mxu0 %v6934_v26 }
 0x373   :  { %4978 = vmatprep.subr.bf16.mxu0 %v6939_v28 }
 0x376   :  { %4979 = vmatpush1.bf16.msra.mxu0 %v6937_v31 }
 0x377   :  { %4980 = vmatprep.subr.bf16.mxu0 %v6942_v34 }
 0x37a   :  { %4981 = vmatpush1.bf16.msra.mxu0 %v6940_v35 }
 0x37b   :  { %4982 = vmatprep.subr.bf16.mxu0 %v6945_v52 }
 0x37e   :  { %4983 = vmatpush1.bf16.msra.mxu0 %v6943_v37 }
 0x37f   :  { %4984 = vmatprep.subr.bf16.mxu0 %v6948_v38 }
 0x382   :  { %4985 = vmatpush1.bf16.msra.mxu0 %v6946_v39 }
 0x383   :  { %4986 = vmatprep.subr.bf16.mxu0 %v6951_v40 }
 0x386   :  { %4987 = vmatpush1.bf16.msra.mxu0 %v6949_v41 }
 0x387   :  { %4988 = vmatprep.subr.bf16.mxu0 %v6954_v36 }
 0x38a   :  { %4989 = vmatpush1.bf16.msra.mxu0 %v6952_v16 }
 0x38b   :  { %4990 = vmatprep.subr.bf16.mxu0 %v6957_v43 }
 0x38e   :  { %4991 = vmatpush1.bf16.msra.mxu0 %v6955_v44 }
 0x38f   :  { %4992 = vmatprep.subr.bf16.mxu0 %v6960_v45 }
 0x392   :  { %4993 = vmatpush1.bf16.msra.mxu0 %v6958_v47 }
 0x393   :  { %4994 = vmatprep.subr.bf16.mxu0 %v6963_v23 }
 0x396   :  { %4995 = vmatpush1.bf16.msra.mxu0 %v6961_v48 }
 0x397   :  { %4996 = vmatprep.subr.bf16.mxu0 %v6966_v49 }
 0x39a   :  { %4997 = vmatpush1.bf16.msra.mxu0 %v6964_v51 }
 0x39b   :  { %4998 = vmatprep.subr.bf16.mxu0 %v6969_v53 }
 0x39e   :  { %4999 = vmatpush1.bf16.msra.mxu0 %v6967_v25 }
 0x39f   :  { %5000 = vmatprep.subr.bf16.mxu0 %v6972_v54 }
 0x3a2   :  { %5001 = vmatpush1.bf16.msra.mxu0 %v6970_v58 }
 0x3a3   :  { %5002 = vmatprep.subr.bf16.mxu0 %v6975_v59 }
 0x3a6   :  { %5003 = vmatpush1.bf16.msra.mxu0 %v6973_v32 }
 0x3d3   :  { %v4479_v4 = vpop.f32.mrb[4].mxu1 }
 0x3d4   :  { %v5909_v11 = vadd.f32 %v4479_v4, %v754_v5  ;;  %v4481_v6 = vpop.f32.mrb[5].mxu1 }
 0x3d5   :  { %v5911_v7 = vadd.f32 %v4481_v6, %v758_v3  ;;  %v4483_v42 = vpop.f32.mrb[6].mxu1 }
 0x3d6   :  { %v5910_v9 = vadd.f32 %v5909_v11, %v7409_v57  ;;  %v4484_v10 = vpop.f32.mrb[7].mxu1 }
 0x3d7   :  { %v5912_v12 = vadd.f32 %v5911_v7, %v7411_v8 }
 0x3d8   :  { %v4529_v13 = vmax.f32 %v5910_v9, 0.0 }
 0x3d9   :  { %v4530_v14 = vmax.f32 %v5912_v12, 0.0 }
 0x3da   :  { %v4533_v15 = vpack.c.bf16 %v4529_v13, %v4529_v13 }
 0x3db   :  { %v4534_v46 = vpack.c.bf16 %v4530_v14, %v4530_v14 }
 0x3dd   :  { %5004 = vmatprep.mubr.bf16.mxu0 %v4534_v46 }
 0x3de   :  { %5005 = vmatmul.mubr.bf16.vlgmr.msra.gmra.mrb[8].mxu0 %v4533_v15 }
 0x4b1   :  { %v5006_v20 = vpop.f32.mrb[8].mxu0 }
 0x4b2   :  { %v5913_v21 = vadd.f32 %v5006_v20, %v4604_v19  ;;  %v5008_v22 = vpop.f32.mrb[9].mxu0 }
 0x4b3   :  { %v5914_v24 = vadd.f32 %v5008_v22, %v4608_v56  ;;  %v5010_v57 = vpop.f32.mrb[10].mxu0 }
 0x4b4   :  { %v5013_v8 = vmax.f32 %v5913_v21, 0.0  ;;  %v5011_v26 = vpop.f32.mrb[11].mxu0 }
 0x4b5   :  { %v5014_v1 = vmax.f32 %v5914_v24, 0.0 }
 0x4b6   :  { %v5015_v28 = vpack.c.bf16 %v5013_v8, %v5013_v8 }
 0x4b7   :  { %v5016_v27 = vpack.c.bf16 %v5014_v1, %v5014_v1 }
 0x4b9   :  { %5184 = vmatprep.mubr.bf16.mxu1 %v5016_v27 }
 0x4ba   :  { %5185 = vmatmul.mubr.bf16.vlgmr.msra.gmra.mrb[8].mxu1 %v5015_v28 }
 0x58d   :  { %v5899_v29 = vpop.f32.mrb[8].mxu1 }
 0x58e   :  { %v5900_v31 = vpop.f32.mrb[9].mxu1 }
 0x58f   :  { %v5901_v33 = vadd.f32 %v5900_v31, %v5899_v29  ;;  %v5902_v61 = vpop.f32.mrb[10].mxu1 }
 0x590   :  { %v5903_v34 = vpop.f32.mrb[11].mxu1 }
 0x591   :  { %v5187_v60 = vadd.f32 %v5901_v33, %v5866_v30 }
 0x593   :  { %v5192_v63 = vpack.c.bf16 %v5187_v60, %v5187_v60 }
 0x595   :  { %5193 = vst [vmem:[#allocation14] sm:$0xf] %v5192_v63 }
 0x596   :  { %7157 = shalt.err (!%p7154_p4)
}
 0x597   :  { %s7158_s15 = scalar_lea.hbm %s7442_s7, 64 }
 0x598   :  { %p7159_p5 = scmp.ne.s32.totalorder %s7442_s7, %s7158_s15  ;;  %p7162_p6 = scmp.lt.u32.totalorder %s7158_s15, %s7442_s7 }
 0x59a   :  { %p7164_p7 = pnand %p7162_p6, %p7159_p5 }
 0x59c   :  { %7167 = shalt.err (!%p7164_p7)
}
 0x59d   :  { %5203 = dma.vmem_to_hbm [thread:$0]  %s5201_s13, 64, %s7442_s7, [#allocation4]  }
 0x59e   :  { %7176 = dma.done.wait [#allocation4], 64  }
 0x59f   :  { %7177 = vsyncadd [#allocation4], 4294967232 }
 0x5a0   :  { %5207 = vsyncpa [#allocation3], 1 }
 0x5a1   :  { %5208 = vsyncpa [#allocation6], 1 }
 0x5a2   :  { %5209 = vsyncpa [#allocation9], 1 }
 0x5a3   :  { %5210 = vsyncpa [#allocation12], 1 }
 0x5a4   :  { %5211 = vsyncpa [#allocation4], 1 }

</bundles_post_ra>
